<compile_context>
chip_gen: v7x
topology: tpu7x:2x2x1
jax: 0.10.0
libtpu: 0.0.40
codegen_flags: <defaults>
</compile_context>

<pallas_src>
import jax
import jax.numpy as jnp
from jax import lax
from jax.experimental import pallas as pl
from jax.experimental.pallas import tpu as pltpu

_CH = 256        # lanes per inner sub-chunk (multiple of 128)
_MAX_TB = 2048   # max batch lanes per grid step


def discriminator_kernel(x_ref, p_ref, w2_ref, w3_ref, o_ref):
    nc = x_ref.shape[0]            # sub-chunks per grid step (static)

    # Packed skinny constants: static slices of the (256, 8) slab are free.
    w1c0 = p_ref[:, 0:1]           # (256, 1)  first input column of W1^T
    w1c1 = p_ref[:, 1:2]           # (256, 1)  second input column of W1^T
    b1 = p_ref[:, 2:3]             # (256, 1)
    b2 = p_ref[0:128, 3:4]         # (128, 1)
    b3 = p_ref[0:64, 4:5]          # (64, 1)
    w4 = p_ref[0:64, 5:6]          # (64, 1)
    b4 = p_ref[0:1, 6:7]           # (1, 1)
    w2 = w2_ref[...]               # (128, 256) bf16
    w3 = w3_ref[...]               # (64, 128)  bf16

    def chunk(c, carry):
        xT = x_ref[c]                                           # (2, CH) f32
        # Linear(2,256)+ReLU: K=2 would starve the MXU, so two rank-1 VPU
        # updates.  Dropout(0.3) -> identity (eval mode).
        h = w1c0 * xT[0:1, :] + w1c1 * xT[1:2, :] + b1          # (256, CH) f32
        h = jnp.maximum(h, 0.0).astype(jnp.bfloat16)
        # Linear(256,128)+ReLU: bf16 MXU matmul, f32 accumulate.
        h = jnp.dot(w2, h, preferred_element_type=jnp.float32) + b2
        h = jnp.maximum(h, 0.0).astype(jnp.bfloat16)            # (128, CH)
        # Linear(128,64)+ReLU: bf16 MXU matmul, f32 accumulate.
        h = jnp.dot(w3, h, preferred_element_type=jnp.float32) + b3
        h = jnp.maximum(h, 0.0)                                 # (64, CH) f32
        # Linear(64,1)+Sigmoid: N=1 matmul wastes a full MXU pass, so VPU mul +
        # sublane reduce; output stays lane-dense (1, CH).
        z = jnp.sum(h * w4, axis=0, keepdims=True) + b4         # (1, CH)
        o_ref[c] = (1.0 / (1.0 + jnp.exp(-z))).astype(o_ref.dtype)
        return carry

    lax.fori_loop(0, nc, chunk, 0, unroll=(nc <= 8))


def _choose_tiles(batch):
    """Pick (lanes-per-step tb, padded batch)."""
    b_pad = pl.cdiv(batch, _CH) * _CH
    tb = min(b_pad, _MAX_TB)
    if b_pad >= 2 * _CH:
        # ensure >= 2 grid steps so the "parallel" axis can shard across
        # v7x's two TensorCores (negligible cost on single-TC v5e/v6e).
        tb = min(tb, max(_CH, (b_pad // (2 * _CH)) * _CH))
    b_pad = pl.cdiv(b_pad, tb) * tb
    return tb, b_pad


def discriminator_forward(x, params):
    """x: (B, 2) float32. params: nn.Linear-style weights. Returns (B, 1)."""
    B, in_dim = x.shape
    assert in_dim == 2
    tb, b_pad = _choose_tiles(B)
    nc_per_step = tb // _CH
    nc_total = b_pad // _CH

    # Input staging: one fused pad + one small transpose (no zeros+set pass).
    x_p = x.astype(jnp.float32)
    if b_pad != B:
        x_p = jnp.pad(x_p, ((0, b_pad - B), (0, 0)))
    # (nc_total, 2, CH): batch on lanes, chunk index as the leading axis so the
    # kernel indexes chunks dynamically on a non-tiled dim.
    x_chunks = jnp.swapaxes(x_p.reshape(nc_total, _CH, 2), 1, 2)

    # Fat-layer weights transposed to (out, in), bf16 for the MXU.
    w2T = params["w2"].T.astype(jnp.bfloat16)   # (128, 256)
    w3T = params["w3"].T.astype(jnp.bfloat16)   # (64, 128)

    # Pack all skinny constants into one lane-dense (256, 8) f32 slab.
    packed = jnp.zeros((256, 8), jnp.float32)
    packed = packed.at[:, 0:2].set(params["w1"].T.astype(jnp.float32))
    packed = packed.at[:, 2].set(params["b1"].reshape(-1).astype(jnp.float32))
    packed = packed.at[:128, 3].set(params["b2"].reshape(-1).astype(jnp.float32))
    packed = packed.at[:64, 4].set(params["b3"].reshape(-1).astype(jnp.float32))
    packed = packed.at[:64, 5].set(params["w4"].reshape(-1).astype(jnp.float32))
    packed = packed.at[:1, 6].set(params["b4"].reshape(-1).astype(jnp.float32))

    flops = 2 * b_pad * (2 * 256 + 256 * 128 + 128 * 64 + 64)
    bytes_accessed = (b_pad * 2 * 4 + b_pad * 4
                      + packed.size * 4 + w2T.size * 2 + w3T.size * 2)

    full2d = lambda a: pl.BlockSpec(a.shape, lambda i: (0, 0))

    out = pl.pallas_call(
        discriminator_kernel,
        out_shape=jax.ShapeDtypeStruct((nc_total, 1, _CH), jnp.float32),
        grid=(b_pad // tb,),
        in_specs=[
            pl.BlockSpec((nc_per_step, 2, _CH), lambda i: (i, 0, 0)),
            full2d(packed),   # constant index map -> weights stay resident
            full2d(w2T),
            full2d(w3T),
        ],
        out_specs=pl.BlockSpec((nc_per_step, 1, _CH), lambda i: (i, 0, 0)),
        compiler_params=pltpu.CompilerParams(
            dimension_semantics=("parallel",)),
        cost_estimate=pl.CostEstimate(
            flops=flops, transcendentals=b_pad, bytes_accessed=bytes_accessed),
    )(x_chunks, packed, w2T, w3T)

    return out.reshape(b_pad)[:B].reshape(B, 1)


def init_params(key):
    """Deterministic init matching nn.Linear shapes (weights stored as
    (in_features, out_features), biases as (1, out_features))."""
    dims = [(2, 256), (256, 128), (128, 64), (64, 1)]
    params = {}
    for idx, (fan_in, fan_out) in enumerate(dims, start=1):
        key, kw, kb = jax.random.split(key, 3)
        bound = 1.0 / jnp.sqrt(fan_in)
        params[f"w{idx}"] = jax.random.uniform(
            kw, (fan_in, fan_out), jnp.float32, -bound, bound)
        params[f"b{idx}"] = jax.random.uniform(
            kb, (1, fan_out), jnp.float32, -bound, bound)
    return params


def ref_forward(x, p):
    h = jnp.maximum(x @ p["w1"] + p["b1"], 0.0)
    h = jnp.maximum(h @ p["w2"] + p["b2"], 0.0)
    h = jnp.maximum(h @ p["w3"] + p["b3"], 0.0)
    return jax.nn.sigmoid(h @ p["w4"] + p["b4"])


if __name__ == "__main__":
    key = jax.random.PRNGKey(0)
    pkey, xkey1, xkey2 = jax.random.split(key, 3)
    params = init_params(pkey)

    # Small shape consistent with the module: batch=16, in_features=2.
    x_small = jax.random.normal(xkey1, (16, 2), jnp.float32)
    out_small = discriminator_forward(x_small, params)
    jax.block_until_ready(out_small)
    assert out_small.shape == (16, 1)
    assert bool(jnp.all((out_small >= 0.0) & (out_small <= 1.0)))
    assert jnp.allclose(out_small, ref_forward(x_small, params),
                        atol=2e-2, rtol=2e-2)

    # Second shape exercising padding + a multi-step parallel grid.
    x_big = jax.random.normal(xkey2, (600, 2), jnp.float32)
    out_big = discriminator_forward(x_big, params)
    jax.block_until_ready(out_big)
    assert out_big.shape == (600, 1)
    assert jnp.allclose(out_big, ref_forward(x_big, params),
                        atol=2e-2, rtol=2e-2)

    print("KERNEL_OK")
</pallas_src>

<mosaic_0001>
module attributes {stable_mosaic.version = 11 : i64} {
  func.func @discriminator_kernel(%arg0: i32, %arg1: memref<1x2x256xf32, #tpu.memory_space<vmem>>, %arg2: memref<256x8xf32, #tpu.memory_space<vmem>>, %arg3: memref<128x256xbf16, #tpu.memory_space<vmem>>, %arg4: memref<64x128xbf16, #tpu.memory_space<vmem>>, %arg5: memref<1x1x256xf32, #tpu.memory_space<vmem>>) attributes {dimension_semantics = [#tpu.dimension_semantics<parallel>], iteration_bounds = array<i64: 1>, scalar_prefetch = 0 : i64, scratch_operands = 0 : i64, tpu.core_type = #tpu.core_type<tc>, window_params = [{transform_indices = @transform_0, window_bounds = array<i64: 1, 2, 256>}, {pipeline_mode = #tpu.pipeline_mode<synchronous>, transform_indices = @transform_1, window_bounds = array<i64: 256, 8>}, {pipeline_mode = #tpu.pipeline_mode<synchronous>, transform_indices = @transform_2, window_bounds = array<i64: 128, 256>}, {pipeline_mode = #tpu.pipeline_mode<synchronous>, transform_indices = @transform_3, window_bounds = array<i64: 64, 128>}, {transform_indices = @transform_4, window_bounds = array<i64: 1, 1, 256>}]} {
    %c0 = arith.constant 0 : index
    %c0_0 = arith.constant 0 : index
    %0 = vector.load %arg2[%c0, %c0_0] : memref<256x8xf32, #tpu.memory_space<vmem>>, vector<256x1xf32>
    %c0_1 = arith.constant 0 : index
    %c1 = arith.constant 1 : index
    %1 = vector.load %arg2[%c0_1, %c1] : memref<256x8xf32, #tpu.memory_space<vmem>>, vector<256x1xf32>
    %c0_2 = arith.constant 0 : index
    %c2 = arith.constant 2 : index
    %2 = vector.load %arg2[%c0_2, %c2] : memref<256x8xf32, #tpu.memory_space<vmem>>, vector<256x1xf32>
    %c0_3 = arith.constant 0 : index
    %c3 = arith.constant 3 : index
    %3 = vector.load %arg2[%c0_3, %c3] : memref<256x8xf32, #tpu.memory_space<vmem>>, vector<128x1xf32>
    %c0_4 = arith.constant 0 : index
    %c4 = arith.constant 4 : index
    %4 = vector.load %arg2[%c0_4, %c4] : memref<256x8xf32, #tpu.memory_space<vmem>>, vector<64x1xf32>
    %c0_5 = arith.constant 0 : index
    %c5 = arith.constant 5 : index
    %5 = vector.load %arg2[%c0_5, %c5] : memref<256x8xf32, #tpu.memory_space<vmem>>, vector<64x1xf32>
    %c0_6 = arith.constant 0 : index
    %c6 = arith.constant 6 : index
    %6 = vector.load %arg2[%c0_6, %c6] : memref<256x8xf32, #tpu.memory_space<vmem>>, vector<1x1xf32>
    %c0_7 = arith.constant 0 : index
    %c0_8 = arith.constant 0 : index
    %7 = vector.load %arg3[%c0_7, %c0_8] : memref<128x256xbf16, #tpu.memory_space<vmem>>, vector<128x256xbf16>
    %c0_9 = arith.constant 0 : index
    %c0_10 = arith.constant 0 : index
    %8 = vector.load %arg4[%c0_9, %c0_10] : memref<64x128xbf16, #tpu.memory_space<vmem>>, vector<64x128xbf16>
    %c0_i32 = arith.constant 0 : i32
    %9 = arith.index_cast %c0_i32 : i32 to index
    %c0_11 = arith.constant 0 : index
    %c0_12 = arith.constant 0 : index
    %10 = vector.load %arg1[%9, %c0_11, %c0_12] : memref<1x2x256xf32, #tpu.memory_space<vmem>>, vector<1x2x256xf32>
    %11 = vector.shape_cast %10 : vector<1x2x256xf32> to vector<2x256xf32>
    %12 = vector.extract_strided_slice %11 {offsets = [0, 0], sizes = [1, 256], strides = [1, 1]} : vector<2x256xf32> to vector<1x256xf32>
    %13 = vector.broadcast %0 : vector<256x1xf32> to vector<256x256xf32>
    %14 = vector.broadcast %12 : vector<1x256xf32> to vector<256x256xf32>
    %15 = arith.mulf %13, %14 : vector<256x256xf32>
    %16 = vector.extract_strided_slice %11 {offsets = [1, 0], sizes = [1, 256], strides = [1, 1]} : vector<2x256xf32> to vector<1x256xf32>
    %17 = vector.broadcast %1 : vector<256x1xf32> to vector<256x256xf32>
    %18 = vector.broadcast %16 : vector<1x256xf32> to vector<256x256xf32>
    %19 = arith.mulf %17, %18 : vector<256x256xf32>
    %20 = arith.addf %15, %19 : vector<256x256xf32>
    %21 = vector.broadcast %2 : vector<256x1xf32> to vector<256x256xf32>
    %22 = arith.addf %20, %21 : vector<256x256xf32>
    %cst = arith.constant 0.000000e+00 : f32
    %23 = vector.broadcast %cst : f32 to vector<256x256xf32>
    %24 = arith.maximumf %22, %23 : vector<256x256xf32>
    %25 = arith.truncf %24 : vector<256x256xf32> to vector<256x256xbf16>
    %cst_13 = arith.constant dense<0.000000e+00> : vector<128x256xf32>
    %26 = tpu.matmul %7, %25, %cst_13 {dimension_numbers = #tpu.dot_dimension_numbers<[1], [0], [0], [1], [0, 0, 1, 1], [], []>} : vector<128x256xbf16>, vector<256x256xbf16>, vector<128x256xf32> -> vector<128x256xf32>
    %27 = vector.broadcast %3 : vector<128x1xf32> to vector<128x256xf32>
    %28 = arith.addf %26, %27 : vector<128x256xf32>
    %cst_14 = arith.constant 0.000000e+00 : f32
    %29 = vector.broadcast %cst_14 : f32 to vector<128x256xf32>
    %30 = arith.maximumf %28, %29 : vector<128x256xf32>
    %31 = arith.truncf %30 : vector<128x256xf32> to vector<128x256xbf16>
    %cst_15 = arith.constant dense<0.000000e+00> : vector<64x256xf32>
    %32 = tpu.matmul %8, %31, %cst_15 {dimension_numbers = #tpu.dot_dimension_numbers<[1], [0], [0], [1], [0, 0, 1, 1], [], []>} : vector<64x128xbf16>, vector<128x256xbf16>, vector<64x256xf32> -> vector<64x256xf32>
    %33 = vector.broadcast %4 : vector<64x1xf32> to vector<64x256xf32>
    %34 = arith.addf %32, %33 : vector<64x256xf32>
    %cst_16 = arith.constant 0.000000e+00 : f32
    %35 = vector.broadcast %cst_16 : f32 to vector<64x256xf32>
    %36 = arith.maximumf %34, %35 : vector<64x256xf32>
    %37 = vector.broadcast %5 : vector<64x1xf32> to vector<64x256xf32>
    %38 = arith.mulf %36, %37 : vector<64x256xf32>
    %cst_17 = arith.constant dense<0.000000e+00> : vector<256xf32>
    %39 = vector.multi_reduction <add>, %38, %cst_17 [0] : vector<64x256xf32> to vector<256xf32>
    %40 = vector.shape_cast %39 : vector<256xf32> to vector<1x256xf32>
    %41 = vector.broadcast %6 : vector<1x1xf32> to vector<1x256xf32>
    %42 = arith.addf %40, %41 : vector<1x256xf32>
    %cst_18 = arith.constant 0.000000e+00 : f32
    %43 = vector.broadcast %cst_18 : f32 to vector<1x256xf32>
    %44 = arith.subf %43, %42 : vector<1x256xf32>
    %45 = math.exp %44 : vector<1x256xf32>
    %cst_19 = arith.constant 1.000000e+00 : f32
    %46 = vector.broadcast %cst_19 : f32 to vector<1x256xf32>
    %47 = arith.addf %46, %45 : vector<1x256xf32>
    %cst_20 = arith.constant 1.000000e+00 : f32
    %48 = vector.broadcast %cst_20 : f32 to vector<1x256xf32>
    %49 = arith.divf %48, %47 : vector<1x256xf32>
    %50 = arith.index_cast %c0_i32 : i32 to index
    %c0_21 = arith.constant 0 : index
    %c0_22 = arith.constant 0 : index
    %51 = vector.load %arg5[%50, %c0_21, %c0_22] : memref<1x1x256xf32, #tpu.memory_space<vmem>>, vector<1x1x256xf32>
    %52 = vector.shape_cast %51 : vector<1x1x256xf32> to vector<1x256xf32>
    %53 = vector.shape_cast %49 : vector<1x256xf32> to vector<1x1x256xf32>
    tpu.vector_store %arg5[%50, %c0_21, %c0_22], %53 {strides = array<i32>} : memref<1x1x256xf32, #tpu.memory_space<vmem>>, vector<1x1x256xf32>,
    %c1_i32 = arith.constant 1 : i32
    return
  }
  func.func @transform_0(%arg0: i32) -> (i32, i32, i32) {
    %c0_i32 = arith.constant 0 : i32
    %c0_i32_0 = arith.constant 0 : i32
    %c0_i32_1 = arith.constant 0 : i32
    return %arg0, %c0_i32, %c0_i32_0 : i32, i32, i32
  }
  func.func @transform_1(%arg0: i32) -> (i32, i32) {
    %c0_i32 = arith.constant 0 : i32
    %c0_i32_0 = arith.constant 0 : i32
    %c0_i32_1 = arith.constant 0 : i32
    return %c0_i32, %c0_i32_0 : i32, i32
  }
  func.func @transform_2(%arg0: i32) -> (i32, i32) {
    %c0_i32 = arith.constant 0 : i32
    %c0_i32_0 = arith.constant 0 : i32
    %c0_i32_1 = arith.constant 0 : i32
    return %c0_i32, %c0_i32_0 : i32, i32
  }
  func.func @transform_3(%arg0: i32) -> (i32, i32) {
    %c0_i32 = arith.constant 0 : i32
    %c0_i32_0 = arith.constant 0 : i32
    %c0_i32_1 = arith.constant 0 : i32
    return %c0_i32, %c0_i32_0 : i32, i32
  }
  func.func @transform_4(%arg0: i32) -> (i32, i32, i32) {
    %c0_i32 = arith.constant 0 : i32
    %c0_i32_0 = arith.constant 0 : i32
    %c0_i32_1 = arith.constant 0 : i32
    return %arg0, %c0_i32, %c0_i32_0 : i32, i32, i32
  }
}

</mosaic_0001>

<bundles_post_ra>
// kernel: tpu_custom_call.1
= control target key start
LH: loop header
LB: loop body
LE: loop exit
PB: predicated region body
PF: predicated region fallthrough
CT: control target
= control target key end

     0   :  { %v2364_v1 = vmov 1   ;;  %v2360_v2 = vmov 0   ;;  %s2354_s0 = inlined_call_operand.vmem [shape: f32[1,2,256], index: 0, kind: input, shape index: {}]   ;;  %s2355_s1 = inlined_call_operand.vmem [shape: f32[256,8], index: 1, kind: input, shape index: {}]   ;;  %s2356_s2 = inlined_call_operand.vmem [shape: bf16[128,256], index: 2, kind: input, shape index: {}]   ;;  %s2357_s3 = inlined_call_operand.vmem [shape: bf16[64,128], index: 3, kind: input, shape index: {}]   ;;  %s2358_s4 = inlined_call_operand.hbm [shape: f32[1,1,256], index: 4, kind: output, shape index: {}]  }
   0x1   :  { %v19_v0 = vld [vmem:[%s2355_s1] sm:$0xff]  ;;  %1492 = vset.pattern.permute.xlu1 %v2364_v1  ;;  %1491 = vset.pattern.permute.xlu0 %v2360_v2  ;;  %v1668_v3 = vld [vmem:[%s2355_s1 + $0x8] sm:$0xff]  ;;  %v21_v4 = vld [vmem:[%s2355_s1 + $0x10] sm:$0xff] }
   0x2   :  { %321 = vperm.xlu1 %1492, %v19_v0   ;;  %79 = vperm.xlu0 %1491, %v19_v0   ;;  %v1679_v5 = vld [vmem:[%s2355_s1 + $0x18] sm:$0xff]  ;;  %v23_v6 = vld [vmem:[%s2355_s1 + $0x20] sm:$0xff] }
   0x3   :  { %1275 = vmatprep.mubr.bf16.mxu1 %v2360_v2 }
   0x6   :  { %325 = vperm.xlu1 %1492, %v1668_v3   ;;  %84 = vperm.xlu0 %1491, %v1668_v3  }
   0xa   :  { %1493 = vset.pattern.permute.xlu1 %v2360_v2  ;;  %89 = vperm.xlu0 %1491, %v21_v4  }
   0xb   :  { %94 = vperm.xlu1 %1493, %v1679_v5  }
   0xe   :  { %1494 = vset.pattern.permute.xlu0 %v2364_v1 }
   0xf   :  { %1495 = vset.pattern.permute.xlu1 %v2364_v1  ;;  %329 = vperm.xlu0 %1494, %v21_v4  }
  0x10   :  { %333 = vperm.xlu1 %1495, %v1679_v5  }
  0x11   :  { %9 = vsyncpa [#allocation3], 0  ;;  %v2362_v7 = vmov 2   ;;  %v25_v8 = vld [vmem:[%s2355_s1 + $0x30] sm:$0xff]  ;;  %v27_v9 = vld [vmem:[%s2355_s1 + $0x40] sm:$0xff]  ;;  %v2359_v55 = vlaneseq }
  0x12   :  { %v24_v10 = vld [vmem:[%s2355_s1 + $0x28] sm:$0xff]  ;;  %v1703_v11 = vld [vmem:[%s2355_s1 + $0x50] sm:$0xff]  ;;  %v1709_v12 = vld [vmem:[%s2355_s1 + $0x60] sm:$0xff] }
  0x13   :  { %337 = vperm.xlu0 %1494, %v23_v6   ;;  %v1716_v13 = vld [vmem:[%s2355_s1 + $0x70] sm:$0xff]  ;;  %v1723_v14 = vld [vmem:[%s2355_s1 + $0x80] sm:$0xff]  ;;  %v26_v16 = vld [vmem:[%s2355_s1 + $0x38] sm:$0xff]  ;;  %v1900_v58 = vshrl.u32 %v2359_v55, 7 }
  0x14   :  { %1496 = vset.pattern.permute.xlu1 %v2362_v7  ;;  %v1730_v15 = vld [vmem:[%s2355_s1 + $0x90] sm:$0xff]  ;;  %v1739_v17 = vld [vmem:[%s2355_s1 + $0xa0] sm:$0xff]  ;;  %v28_v22 = vld [vmem:[%s2355_s1 + $0x48] sm:$0xff] }
  0x15   :  { %595 = vperm.xlu1 %1496, %v19_v0   ;;  %v1745_v18 = vld [vmem:[%s2355_s1 + $0xb0] sm:$0xff]  ;;  %v1752_v19 = vld [vmem:[%s2355_s1 + $0xc0] sm:$0xff]  ;;  %v30_v24 = vld [vmem:[%s2355_s1 + $0x58] sm:$0xff]  ;;  %2370 = vst [vmem:[#allocation5_spill] sm:$0xff] %v1900_v58  ;;  %v450_v61 = vsub.s32 1, %v1900_v58  ;;  %v454_v62 = vsub.s32 3, %v1900_v58 }
  0x16   :  { %v1759_v20 = vld [vmem:[%s2355_s1 + $0xd0] sm:$0xff]  ;;  %v1766_v21 = vld [vmem:[%s2355_s1 + $0xe0] sm:$0xff]  ;;  %v32_v25 = vld [vmem:[%s2355_s1 + $0x68] sm:$0xff] }
  0x17   :  { %345 = vperm.xlu0 %1494, %v25_v8   ;;  %v1775_v23 = vld [vmem:[%s2355_s1 + $0xf0] sm:$0xff]  ;;  %v34_v26 = vld [vmem:[%s2355_s1 + $0x78] sm:$0xff]  ;;  %v36_v27 = vld [vmem:[%s2355_s1 + $0x88] sm:$0xff] }
  0x18   :  { %v38_v28 = vld [vmem:[%s2355_s1 + $0x98] sm:$0xff]  ;;  %v1809_v29 = vld [vmem:[%s2355_s1 + $0xa8] sm:$0xff]  ;;  %v76_v0 = vld [vmem:[%s2354_s0] sm:$0xf] }
  0x19   :  { %1497 = vset.pattern.permute.xlu1 %v2360_v2  ;;  %v1816_v30 = vld [vmem:[%s2355_s1 + $0xb8] sm:$0xff]  ;;  %v1824_v31 = vld [vmem:[%s2355_s1 + $0xc8] sm:$0xff] }
  0x1a   :  { %99 = vperm.xlu1 %1497, %v23_v6   ;;  %v1830_v32 = vld [vmem:[%s2355_s1 + $0xd8] sm:$0xff]  ;;  %v1841_v35 = vld [vmem:[%s2355_s1 + $0xe8] sm:$0xff] }
  0x1b   :  { %353 = vperm.xlu0 %1494, %v27_v9  }
  0x1e   :  { %104 = vperm.xlu1 %1497, %v24_v10  }
  0x1f   :  { %361 = vperm.xlu0 %1494, %v1703_v11  }
  0x22   :  { %1498 = vset.pattern.permute.xlu1 %v2364_v1 }
  0x23   :  { %341 = vperm.xlu1 %1498, %v24_v10   ;;  %369 = vperm.xlu0 %1494, %v1709_v12  }
  0x27   :  { %1499 = vset.pattern.permute.xlu1 %v2362_v7  ;;  %377 = vperm.xlu0 %1494, %v1716_v13  }
  0x28   :  { %603 = vperm.xlu1 %1499, %v21_v4   ;;  %v244_v4 = vsub.s32 2, %v1900_v58 }
  0x2b   :  { %385 = vperm.xlu0 %1494, %v1723_v14  }
  0x2c   :  { %1500 = vset.pattern.permute.xlu1 %v2360_v2 }
  0x2d   :  { %109 = vperm.xlu1 %1500, %v25_v8  }
  0x2f   :  { %393 = vperm.xlu0 %1494, %v1730_v15  }
  0x31   :  { %114 = vperm.xlu1 %1500, %v26_v16  }
  0x33   :  { %401 = vperm.xlu0 %1494, %v1739_v17  }
  0x35   :  { %1501 = vset.pattern.permute.xlu1 %v2364_v1 }
  0x36   :  { %349 = vperm.xlu1 %1501, %v26_v16  }
  0x37   :  { %409 = vperm.xlu0 %1494, %v1745_v18  }
  0x3a   :  { %1502 = vset.pattern.permute.xlu1 %v2362_v7 }
  0x3b   :  { %611 = vperm.xlu1 %1502, %v23_v6   ;;  %417 = vperm.xlu0 %1494, %v1752_v19   ;;  %v455_v6 = vrot.slane %v76_v0, %v454_v62 }
  0x3f   :  { %1503 = vset.pattern.permute.xlu1 %v2360_v2  ;;  %425 = vperm.xlu0 %1494, %v1759_v20  }
  0x40   :  { %119 = vperm.xlu1 %1503, %v27_v9  }
  0x43   :  { %433 = vperm.xlu0 %1494, %v1766_v21  }
  0x44   :  { %124 = vperm.xlu1 %1503, %v28_v22  }
  0x47   :  { %441 = vperm.xlu0 %1494, %v1775_v23  }
  0x48   :  { %1504 = vset.pattern.permute.xlu1 %v2364_v1 }
  0x49   :  { %357 = vperm.xlu1 %1504, %v28_v22  }
  0x4b   :  { %1537 = vset.pattern.permute.xlu0 %v2362_v7 }
  0x4c   :  { %599 = vperm.xlu0 %1537, %v1668_v3   ;;  %v240_v3 = vsub.s32 0, %v1900_v58 }
  0x4d   :  { %1505 = vset.pattern.permute.xlu1 %v2362_v7 }
  0x4e   :  { %619 = vperm.xlu1 %1505, %v25_v8  }
  0x50   :  { %607 = vperm.xlu0 %1537, %v1679_v5   ;;  %v451_v5 = vrot.slane %v76_v0, %v450_v61 }
  0x52   :  { %1506 = vset.pattern.permute.xlu1 %v2360_v2 }
  0x53   :  { %129 = vperm.xlu1 %1506, %v1703_v11  }
  0x54   :  { %615 = vperm.xlu0 %1537, %v24_v10   ;;  %v241_v10 = vrot.slane %v76_v0, %v240_v3 }
  0x57   :  { %134 = vperm.xlu1 %1506, %v30_v24  }
  0x58   :  { %623 = vperm.xlu0 %1537, %v26_v16   ;;  %v1929_v16 = vrot.slane %v241_v10, %v240_v3 }
  0x5b   :  { %1507 = vset.pattern.permute.xlu1 %v2364_v1 }
  0x5c   :  { %365 = vperm.xlu1 %1507, %v30_v24   ;;  %631 = vperm.xlu0 %1537, %v28_v22  }
  0x60   :  { %1508 = vset.pattern.permute.xlu1 %v2362_v7  ;;  %639 = vperm.xlu0 %1537, %v30_v24  }
  0x61   :  { %627 = vperm.xlu1 %1508, %v27_v9  }
  0x64   :  { %647 = vperm.xlu0 %1537, %v32_v25  }
  0x65   :  { %1509 = vset.pattern.permute.xlu1 %v2360_v2 }
  0x66   :  { %139 = vperm.xlu1 %1509, %v1709_v12  }
  0x68   :  { %655 = vperm.xlu0 %1537, %v34_v26  }
  0x6a   :  { %144 = vperm.xlu1 %1509, %v32_v25  }
  0x6c   :  { %663 = vperm.xlu0 %1537, %v36_v27  }
  0x6e   :  { %1510 = vset.pattern.permute.xlu1 %v2364_v1 }
  0x6f   :  { %373 = vperm.xlu1 %1510, %v32_v25  }
  0x70   :  { %671 = vperm.xlu0 %1537, %v38_v28  }
  0x73   :  { %1511 = vset.pattern.permute.xlu1 %v2362_v7 }
  0x74   :  { %635 = vperm.xlu1 %1511, %v1703_v11   ;;  %679 = vperm.xlu0 %1537, %v1809_v29   ;;  %v245_v11 = vrot.slane %v76_v0, %v244_v4 }
  0x76   :  { %v1931_v22 = vrot.slane %v245_v11, %v240_v3 }
  0x78   :  { %1512 = vset.pattern.permute.xlu1 %v2360_v2  ;;  %687 = vperm.xlu0 %1537, %v1816_v30  }
  0x79   :  { %149 = vperm.xlu1 %1512, %v1716_v13  }
  0x7c   :  { %695 = vperm.xlu0 %1537, %v1824_v31  }
  0x7d   :  { %154 = vperm.xlu1 %1512, %v34_v26  }
  0x80   :  { %703 = vperm.xlu0 %1537, %v1830_v32  }
  0x81   :  { %1513 = vset.pattern.permute.xlu1 %v2364_v1  ;;  %v1834_v33 = vpop.permute.xlu1 %321  ;;  %v1836_v34 = vpop.permute.xlu0 %79 }
  0x82   :  { %381 = vperm.xlu1 %1513, %v34_v26  }
  0x84   :  { %711 = vperm.xlu0 %1537, %v1841_v35  }
  0x85   :  { %v1844_v36 = vpop.permute.xlu1 %325  ;;  %v1846_v37 = vpop.permute.xlu0 %84 }
  0x86   :  { %1514 = vset.pattern.permute.xlu1 %v2362_v7 }
  0x87   :  { %643 = vperm.xlu1 %1514, %v1709_v12   ;;  %v1923_v12 = vrot.slane %v451_v5, %v450_v61  ;;  %v259_v5 = vmul.f32 %v1931_v22, %v1846_v37 }
  0x89   :  { %v1850_v38 = vpop.permute.xlu0 %89  ;;  %v466_v25 = vmul.f32 %v1923_v12, %v1834_v33  ;;  %v468_v0 = vmul.f32 %v1923_v12, %v1844_v36 }
  0x8a   :  { %v1852_v39 = vpop.permute.xlu1 %94  ;;  %v261_v3 = vmul.f32 %v1931_v22, %v1850_v38 }
  0x8b   :  { %1515 = vset.pattern.permute.xlu1 %v2360_v2 }
  0x8c   :  { %159 = vperm.xlu1 %1515, %v1723_v14  }
  0x8e   :  { %v1856_v40 = vpop.permute.xlu0 %329 }
  0x8f   :  { %v1858_v41 = vpop.permute.xlu1 %333 }
  0x90   :  { %164 = vperm.xlu1 %1515, %v36_v27  }
  0x92   :  { %v1860_v42 = vpop.permute.xlu0 %337 }
  0x94   :  { %1516 = vset.pattern.permute.xlu1 %v2364_v1  ;;  %v1863_v43 = vpop.permute.xlu1 %595 }
  0x95   :  { %389 = vperm.xlu1 %1516, %v36_v27  }
  0x96   :  { %v1865_v44 = vpop.permute.xlu0 %345 }
  0x99   :  { %1517 = vset.pattern.permute.xlu1 %v2362_v7  ;;  %v1868_v45 = vpop.permute.xlu1 %99 }
  0x9a   :  { %651 = vperm.xlu1 %1517, %v1716_v13   ;;  %v1871_v46 = vpop.permute.xlu0 %353  ;;  %v1925_v13 = vrot.slane %v455_v6, %v450_v61  ;;  %v260_v61 = vmul.f32 %v1929_v16, %v1850_v38  ;;  %v472_v6 = vmul.f32 %v1923_v12, %v1858_v41 }
  0x9c   :  { %v467_v26 = vmul.f32 %v1925_v13, %v1834_v33  ;;  %v258_v33 = vmul.f32 %v1929_v16, %v1846_v37  ;;  %v469_v4 = vmul.f32 %v1925_v13, %v1844_v36  ;;  %v473_v10 = vmul.f32 %v1925_v13, %v1858_v41 }
  0x9d   :  { %v1873_v47 = vpop.permute.xlu1 %104  ;;  %v263_v36 = vmul.f32 %v1931_v22, %v1852_v39 }
  0x9e   :  { %1518 = vset.pattern.permute.xlu1 %v2360_v2  ;;  %v1876_v48 = vpop.permute.xlu0 %361  ;;  %v533_v41 = vadd.f32 %v469_v4, %v259_v5  ;;  %v267_v4 = vmul.f32 %v1931_v22, %v1873_v47 }
  0x9f   :  { %169 = vperm.xlu1 %1518, %v1730_v15  }
  0xa2   :  { %v1879_v49 = vpop.permute.xlu1 %341  ;;  %v1881_v50 = vpop.permute.xlu0 %369 }
  0xa3   :  { %174 = vperm.xlu1 %1518, %v38_v28  }
  0xa6   :  { %v1883_v51 = vpop.permute.xlu0 %377 }
  0xa7   :  { %1519 = vset.pattern.permute.xlu1 %v2364_v1  ;;  %v1886_v52 = vpop.permute.xlu1 %603 }
  0xa8   :  { %397 = vperm.xlu1 %1519, %v38_v28   ;;  %v256_v28 = vmul.f32 %v1929_v16, %v1836_v34 }
  0xaa   :  { %v1888_v53 = vpop.permute.xlu0 %385 }
  0xac   :  { %1520 = vset.pattern.permute.xlu1 %v2362_v7  ;;  %v1891_v54 = vpop.permute.xlu1 %109 }
  0xad   :  { %659 = vperm.xlu1 %1520, %v1723_v14  }
  0xae   :  { %v1894_v56 = vpop.permute.xlu0 %393 }
  0xb0   :  { %v1896_v57 = vpop.permute.xlu1 %114 }
  0xb1   :  { %1521 = vset.pattern.permute.xlu1 %v2360_v2 }
  0xb2   :  { %179 = vperm.xlu1 %1521, %v1739_v17   ;;  %v1903_v59 = vpop.permute.xlu0 %401 }
  0xb5   :  { %v1905_v60 = vpop.permute.xlu1 %349 }
  0xb6   :  { %184 = vperm.xlu1 %1521, %v1809_v29   ;;  %v1910_v63 = vpop.permute.xlu0 %409 }
  0xba   :  { %1522 = vset.pattern.permute.xlu1 %v2364_v1  ;;  %v1918_v8 = vpop.permute.xlu1 %611  ;;  %v1920_v9 = vpop.permute.xlu0 %417  ;;  %v532_v1 = vadd.f32 %v468_v0, %v258_v33 }
  0xbb   :  { %405 = vperm.xlu1 %1522, %v1809_v29   ;;  %v257_v29 = vmul.f32 %v1931_v22, %v1836_v34  ;;  %v471_v34 = vmul.f32 %v1925_v13, %v1856_v40 }
  0xbd   :  { %v531_v11 = vadd.f32 %v467_v26, %v257_v29  ;;  %v535_v37 = vadd.f32 %v471_v34, %v261_v3  ;;  %v474_v26 = vmul.f32 %v1923_v12, %v1860_v42  ;;  %v475_v29 = vmul.f32 %v1925_v13, %v1860_v42 }
  0xbe   :  { %v1927_v14 = vpop.permute.xlu0 %425  ;;  %v478_v42 = vmul.f32 %v1923_v12, %v1865_v44  ;;  %v479_v34 = vmul.f32 %v1925_v13, %v1865_v44 }
  0xbf   :  { %2371 = vst [vmem:[#allocation6_spill] sm:$0xff] %v1927_v14  ;;  %1523 = vset.pattern.permute.xlu1 %v2362_v7  ;;  %v1934_v24 = vpop.permute.xlu1 %119 }
  0xc0   :  { %667 = vperm.xlu1 %1523, %v1730_v15   ;;  %v470_v15 = vmul.f32 %v1923_v12, %v1856_v40  ;;  %v262_v40 = vmul.f32 %v1929_v16, %v1852_v39 }
  0xc2   :  { %v1941_v27 = vpop.permute.xlu0 %433  ;;  %v534_v55 = vadd.f32 %v470_v15, %v260_v61  ;;  %v536_v58 = vadd.f32 %v472_v6, %v262_v40  ;;  %v476_v61 = vmul.f32 %v1923_v12, %v1879_v49  ;;  %v477_v15 = vmul.f32 %v1925_v13, %v1879_v49 }
  0xc3   :  { %2372 = vst [vmem:[#allocation7_spill] sm:$0xff] %v1941_v27  ;;  %v1951_v62 = vpop.permute.xlu1 %124  ;;  %v537_v27 = vadd.f32 %v473_v10, %v263_v36  ;;  %v2374_v49 = vmov 1  }
  0xc4   :  { %1524 = vset.pattern.permute.xlu1 %v2360_v2  ;;  %v530_v2 = vadd.f32 %v466_v25, %v256_v28  ;;  %v264_v25 = vmul.f32 %v1929_v16, %v1868_v45  ;;  %v265_v28 = vmul.f32 %v1931_v22, %v1868_v45  ;;  %v726_v0 = vadd.f32 %v1886_v52, %v534_v55 }
  0xc5   :  { %189 = vperm.xlu1 %1524, %v1745_v18   ;;  %v266_v45 = vmul.f32 %v1929_v16, %v1873_v47 }
  0xc6   :  { %v1971_v38 = vpop.permute.xlu0 %441  ;;  %v722_v39 = vadd.f32 %v1863_v43, %v530_v2  ;;  %v727_v2 = vadd.f32 %v1886_v52, %v535_v37  ;;  %v538_v6 = vadd.f32 %v474_v26, %v264_v25  ;;  %v539_v40 = vadd.f32 %v475_v29, %v265_v28 }
  0xc7   :  { %2373 = vst [vmem:[#allocation8_spill] sm:$0xff] %v1971_v38  ;;  %v723_v38 = vadd.f32 %v1863_v43, %v531_v11  ;;  %v790_v11 = vmax.f32 %v726_v0, 0.0  ;;  %v540_v44 = vadd.f32 %v476_v61, %v266_v45  ;;  %v541_v37 = vadd.f32 %v477_v15, %v267_v4 }
  0xc8   :  { %v1977_v7 = vpop.permute.xlu1 %357  ;;  %v480_v26 = vmul.f32 %v1923_v12, %v1905_v60  ;;  %v481_v29 = vmul.f32 %v1925_v13, %v1905_v60  ;;  %v2375_v15 = vmov 2  }
  0xc9   :  { %194 = vperm.xlu1 %1524, %v1816_v30   ;;  %v787_v5 = vmax.f32 %v723_v38, 0.0  ;;  %v269_v38 = vmul.f32 %v1931_v22, %v1891_v54 }
  0xcb   :  { %v600_v33 = vpop.permute.xlu0 %599  ;;  %v543_v4 = vadd.f32 %v479_v34, %v269_v38 }
  0xcc   :  { %v724_v43 = vadd.f32 %v600_v33, %v532_v1  ;;  %v725_v3 = vadd.f32 %v600_v33, %v533_v41  ;;  %v786_v1 = vmax.f32 %v722_v39, 0.0  ;;  %v791_v41 = vmax.f32 %v727_v2, 0.0 }
  0xcd   :  { %1525 = vset.pattern.permute.xlu1 %v2374_v49  ;;  %v620_v55 = vpop.permute.xlu1 %619  ;;  %v268_v33 = vmul.f32 %v1929_v16, %v1891_v54  ;;  %v731_v39 = vadd.f32 %v1918_v8, %v539_v40  ;;  %v271_v54 = vmul.f32 %v1931_v22, %v1896_v57 }
  0xce   :  { %v788_v10 = vmax.f32 %v724_v43, 0.0  ;;  %413 = vperm.xlu1 %1525, %v1816_v30   ;;  %v789_v52 = vmax.f32 %v725_v3, 0.0 }
  0xcf   :  { %v608_v36 = vpop.permute.xlu0 %607  ;;  %v542_v45 = vadd.f32 %v478_v42, %v268_v33  ;;  %v485_v33 = vmul.f32 %v1925_v13, %v1977_v7 }
  0xd0   :  { %v728_v47 = vadd.f32 %v608_v36, %v536_v58  ;;  %v729_v14 = vadd.f32 %v608_v36, %v537_v27  ;;  %v851_v30 = vpack.c.bf16 %v789_v52, %v787_v5  ;;  %v850_v25 = vpack.c.bf16 %v788_v10, %v786_v1 }
  0xd1   :  { %v270_v58 = vmul.f32 %v1929_v16, %v1896_v57  ;;  %v730_v27 = vadd.f32 %v1918_v8, %v538_v6  ;;  %v795_v10 = vmax.f32 %v731_v39, 0.0  ;;  %v545_v57 = vadd.f32 %v481_v29, %v271_v54 }
  0xd2   :  { %v792_v28 = vmax.f32 %v728_v47, 0.0  ;;  %v793_v61 = vmax.f32 %v729_v14, 0.0  ;;  %1526 = vset.pattern.permute.xlu1 %v2375_v15  ;;  %v2016_v0 = vpop.permute.xlu1 %129  ;;  %1026 = vmatprep.subr.bf16.mxu0 %v851_v30  ;;  %v482_v8 = vmul.f32 %v1923_v12, %v1871_v46  ;;  %v735_v36 = vadd.f32 %v620_v55, %v543_v4 }
  0xd3   :  { %675 = vperm.xlu1 %1526, %v1739_v17   ;;  %v616_v60 = vpop.permute.xlu0 %615  ;;  %1027 = vmatpush1.bf16.msra.mxu0 %v850_v25  ;;  %v544_v5 = vadd.f32 %v480_v26, %v270_v58  ;;  %v794_v6 = vmax.f32 %v730_v27, 0.0  ;;  %v734_v17 = vadd.f32 %v620_v55, %v542_v45  ;;  %v2376_v47 = vmov 0  }
  0xd4   :  { %v732_v2 = vadd.f32 %v616_v60, %v540_v44  ;;  %v733_v43 = vadd.f32 %v616_v60, %v541_v37  ;;  %v853_v14 = vpack.c.bf16 %v793_v61, %v791_v41  ;;  %v852_v3 = vpack.c.bf16 %v792_v28, %v790_v11 }
  0xd5   :  { %v483_v37 = vmul.f32 %v1925_v13, %v1871_v46  ;;  %v484_v41 = vmul.f32 %v1923_v12, %v1977_v7  ;;  %v272_v55 = vmul.f32 %v1929_v16, %v1934_v24  ;;  %v273_v26 = vmul.f32 %v1931_v22, %v1934_v24 }
  0xd6   :  { %v796_v52 = vmax.f32 %v732_v2, 0.0  ;;  %v797_v1 = vmax.f32 %v733_v43, 0.0  ;;  %v135_v40 = vpop.permute.xlu1 %134  ;;  %1028 = vmatprep.subr.bf16.mxu0 %v853_v14  ;;  %v274_v29 = vmul.f32 %v1929_v16, %v1951_v62  ;;  %v275_v46 = vmul.f32 %v1931_v22, %v1951_v62 }
  0xd7   :  { %1527 = vset.pattern.permute.xlu1 %v2376_v47  ;;  %v624_v44 = vpop.permute.xlu0 %623  ;;  %1029 = vmatpush1.bf16.msra.mxu0 %v852_v3  ;;  %v798_v39 = vmax.f32 %v734_v17, 0.0  ;;  %v799_v28 = vmax.f32 %v735_v36, 0.0  ;;  %v546_v43 = vadd.f32 %v482_v8, %v272_v55  ;;  %v547_v14 = vadd.f32 %v483_v37, %v273_v26 }
  0xd8   :  { %v736_v11 = vadd.f32 %v624_v44, %v544_v5  ;;  %v737_v42 = vadd.f32 %v624_v44, %v545_v57  ;;  %199 = vperm.xlu1 %1527, %v1752_v19   ;;  %v855_v34 = vpack.c.bf16 %v797_v1, %v795_v10  ;;  %v854_v38 = vpack.c.bf16 %v796_v52, %v794_v6 }
  0xd9   :  { %v548_v58 = vadd.f32 %v484_v41, %v274_v29  ;;  %v549_v54 = vadd.f32 %v485_v33, %v275_v46  ;;  %v279_v44 = vmul.f32 %v1931_v22, %v135_v40 }
  0xda   :  { %v800_v30 = vmax.f32 %v736_v11, 0.0  ;;  %v801_v25 = vmax.f32 %v737_v42, 0.0  ;;  %1030 = vmatprep.subr.bf16.mxu0 %v855_v34  ;;  %v486_v11 = vmul.f32 %v1923_v12, %v1876_v48  ;;  %v276_v42 = vmul.f32 %v1929_v16, %v2016_v0 }
  0xdb   :  { %v366_v61 = vpop.permute.xlu1 %365  ;;  %1031 = vmatpush1.bf16.msra.mxu0 %v854_v38  ;;  %v632_v7 = vpop.permute.xlu0 %631  ;;  %v277_v34 = vmul.f32 %v1931_v22, %v2016_v0 }
  0xdc   :  { %204 = vperm.xlu1 %1527, %v1824_v31   ;;  %v857_v27 = vpack.c.bf16 %v801_v25, %v799_v28  ;;  %v856_v24 = vpack.c.bf16 %v800_v30, %v798_v39  ;;  %v740_v60 = vadd.f32 %v632_v7, %v548_v58  ;;  %v741_v2 = vadd.f32 %v632_v7, %v549_v54 }
  0xdd   :  { %v488_v17 = vmul.f32 %v1923_v12, %v366_v61  ;;  %v489_v36 = vmul.f32 %v1925_v13, %v366_v61  ;;  %v550_v26 = vadd.f32 %v486_v11, %v276_v42 }
  0xde   :  { %1032 = vmatprep.subr.bf16.mxu0 %v857_v27  ;;  %v804_v4 = vmax.f32 %v740_v60, 0.0  ;;  %v805_v5 = vmax.f32 %v741_v2, 0.0  ;;  %v490_v2 = vmul.f32 %v1923_v12, %v1881_v50 }
  0xdf   :  { %1033 = vmatpush1.bf16.msra.mxu0 %v856_v24  ;;  %v553_v41 = vadd.f32 %v489_v36, %v279_v44  ;;  %v640_v38 = vpop.permute.xlu0 %639 }
  0xe0   :  { %v628_v3 = vpop.permute.xlu1 %627  ;;  %1528 = vset.pattern.permute.xlu1 %v2374_v49 }
  0xe1   :  { %v738_v62 = vadd.f32 %v628_v3, %v546_v43  ;;  %v739_v45 = vadd.f32 %v628_v3, %v547_v14  ;;  %421 = vperm.xlu1 %1528, %v1824_v31   ;;  %v278_v31 = vmul.f32 %v1929_v16, %v135_v40  ;;  %v745_v55 = vadd.f32 %v640_v38, %v553_v41 }
  0xe3   :  { %v802_v10 = vmax.f32 %v738_v62, 0.0  ;;  %v803_v52 = vmax.f32 %v739_v45, 0.0  ;;  %v552_v37 = vadd.f32 %v488_v17, %v278_v31  ;;  %v809_v39 = vmax.f32 %v745_v55, 0.0 }
  0xe5   :  { %v140_v1 = vpop.permute.xlu1 %139  ;;  %v859_v57 = vpack.c.bf16 %v805_v5, %v803_v52  ;;  %v858_v6 = vpack.c.bf16 %v804_v4, %v802_v10  ;;  %1529 = vset.pattern.permute.xlu1 %v2375_v15  ;;  %v744_v40 = vadd.f32 %v640_v38, %v552_v37  ;;  %v648_v4 = vpop.permute.xlu0 %647  ;;  %v50_v38 = vld [vmem:[%s2355_s1 + $0xf8] sm:$0xff] }
  0xe6   :  { %683 = vperm.xlu1 %1529, %v1745_v18   ;;  %v487_v18 = vmul.f32 %v1925_v13, %v1876_v48  ;;  %v280_v43 = vmul.f32 %v1929_v16, %v140_v1  ;;  %v281_v14 = vmul.f32 %v1931_v22, %v140_v1 }
  0xe7   :  { %1034 = vmatprep.subr.bf16.mxu0 %v859_v57  ;;  %v808_v46 = vmax.f32 %v744_v40, 0.0 }
  0xe8   :  { %1035 = vmatpush1.bf16.msra.mxu0 %v858_v6  ;;  %v551_v30 = vadd.f32 %v487_v18, %v277_v34  ;;  %v554_v52 = vadd.f32 %v490_v2, %v280_v43 }
  0xe9   :  { %v145_v8 = vpop.permute.xlu1 %144 }
  0xea   :  { %1530 = vset.pattern.permute.xlu1 %v2376_v47  ;;  %v283_v60 = vmul.f32 %v1931_v22, %v145_v8 }
  0xeb   :  { %209 = vperm.xlu1 %1530, %v1759_v20  }
  0xee   :  { %v374_v33 = vpop.permute.xlu1 %373 }
  0xef   :  { %214 = vperm.xlu1 %1530, %v1830_v32   ;;  %v492_v27 = vmul.f32 %v1923_v12, %v374_v33  ;;  %v493_v24 = vmul.f32 %v1925_v13, %v374_v33  ;;  %v494_v33 = vmul.f32 %v1923_v12, %v1883_v51 }
  0xf1   :  { %v557_v62 = vadd.f32 %v493_v24, %v283_v60 }
  0xf3   :  { %v636_v25 = vpop.permute.xlu1 %635  ;;  %1531 = vset.pattern.permute.xlu1 %v2374_v49  ;;  %v749_v10 = vadd.f32 %v648_v4, %v557_v62 }
  0xf4   :  { %v742_v48 = vadd.f32 %v636_v25, %v550_v26  ;;  %v743_v29 = vadd.f32 %v636_v25, %v551_v30  ;;  %429 = vperm.xlu1 %1531, %v1830_v32   ;;  %v282_v32 = vmul.f32 %v1929_v16, %v145_v8 }
  0xf5   :  { %v813_v36 = vmax.f32 %v749_v10, 0.0 }
  0xf6   :  { %v806_v0 = vmax.f32 %v742_v48, 0.0  ;;  %v807_v28 = vmax.f32 %v743_v29, 0.0  ;;  %v556_v3 = vadd.f32 %v492_v27, %v282_v32  ;;  %v656_v48 = vpop.permute.xlu0 %655 }
  0xf8   :  { %v150_v61 = vpop.permute.xlu1 %149  ;;  %v861_v7 = vpack.c.bf16 %v809_v39, %v807_v28  ;;  %v860_v58 = vpack.c.bf16 %v808_v46, %v806_v0  ;;  %1532 = vset.pattern.permute.xlu1 %v2375_v15  ;;  %v748_v5 = vadd.f32 %v648_v4, %v556_v3  ;;  %v498_v3 = vmul.f32 %v1923_v12, %v1888_v53 }
  0xf9   :  { %691 = vperm.xlu1 %1532, %v1752_v19   ;;  %v491_v19 = vmul.f32 %v1925_v13, %v1881_v50  ;;  %v284_v40 = vmul.f32 %v1929_v16, %v150_v61  ;;  %v285_v55 = vmul.f32 %v1931_v22, %v150_v61 }
  0xfa   :  { %1036 = vmatprep.subr.bf16.mxu0 %v861_v7  ;;  %v812_v50 = vmax.f32 %v748_v5, 0.0  ;;  %v664_v10 = vpop.permute.xlu0 %663 }
  0xfb   :  { %1037 = vmatpush1.bf16.msra.mxu0 %v860_v58  ;;  %v555_v57 = vadd.f32 %v491_v19, %v281_v14  ;;  %v558_v39 = vadd.f32 %v494_v33, %v284_v40 }
  0xfc   :  { %v155_v54 = vpop.permute.xlu1 %154 }
  0xfd   :  { %1533 = vset.pattern.permute.xlu1 %v2376_v47  ;;  %v287_v41 = vmul.f32 %v1931_v22, %v155_v54 }
  0xfe   :  { %219 = vperm.xlu1 %1533, %v1766_v21  }
 0x101   :  { %v382_v45 = vpop.permute.xlu1 %381 }
 0x102   :  { %224 = vperm.xlu1 %1533, %v1841_v35   ;;  %v496_v34 = vmul.f32 %v1923_v12, %v382_v45  ;;  %v497_v37 = vmul.f32 %v1925_v13, %v382_v45 }
 0x104   :  { %v561_v30 = vadd.f32 %v497_v37, %v287_v41 }
 0x106   :  { %v644_v6 = vpop.permute.xlu1 %643  ;;  %1534 = vset.pattern.permute.xlu1 %v2374_v49  ;;  %v753_v46 = vadd.f32 %v656_v48, %v561_v30 }
 0x107   :  { %v746_v8 = vadd.f32 %v644_v6, %v554_v52  ;;  %v747_v17 = vadd.f32 %v644_v6, %v555_v57  ;;  %437 = vperm.xlu1 %1534, %v1841_v35   ;;  %v286_v35 = vmul.f32 %v1929_v16, %v155_v54 }
 0x108   :  { %v817_v54 = vmax.f32 %v753_v46, 0.0 }
 0x109   :  { %v810_v1 = vmax.f32 %v746_v8, 0.0  ;;  %v811_v31 = vmax.f32 %v747_v17, 0.0  ;;  %v560_v26 = vadd.f32 %v496_v34, %v286_v35 }
 0x10b   :  { %v160_v44 = vpop.permute.xlu1 %159  ;;  %v863_v11 = vpack.c.bf16 %v813_v36, %v811_v31  ;;  %v862_v18 = vpack.c.bf16 %v812_v50, %v810_v1  ;;  %1535 = vset.pattern.permute.xlu1 %v2375_v15  ;;  %v752_v29 = vadd.f32 %v656_v48, %v560_v26  ;;  %v672_v48 = vpop.permute.xlu0 %671 }
 0x10c   :  { %699 = vperm.xlu1 %1535, %v1759_v20   ;;  %v495_v20 = vmul.f32 %v1925_v13, %v1883_v51  ;;  %v289_v62 = vmul.f32 %v1931_v22, %v160_v44 }
 0x10d   :  { %1038 = vmatprep.subr.bf16.mxu0 %v863_v11  ;;  %v816_v58 = vmax.f32 %v752_v29, 0.0 }
 0x10e   :  { %1039 = vmatpush1.bf16.msra.mxu0 %v862_v18  ;;  %v559_v0 = vadd.f32 %v495_v20, %v285_v55  ;;  %v502_v20 = vmul.f32 %v1923_v12, %v1894_v56 }
 0x10f   :  { %v165_v42 = vpop.permute.xlu1 %164 }
 0x110   :  { %1536 = vset.pattern.permute.xlu1 %v2376_v47  ;;  %v290_v43 = vmul.f32 %v1929_v16, %v165_v42  ;;  %v291_v14 = vmul.f32 %v1931_v22, %v165_v42 }
 0x111   :  { %229 = vperm.xlu1 %1536, %v1775_v23  }
 0x114   :  { %v390_v25 = vpop.permute.xlu1 %389 }
 0x115   :  { %234 = vperm.xlu1 %1536, %v50_v38   ;;  %v500_v19 = vmul.f32 %v1923_v12, %v390_v25 }
 0x117   :  { %v564_v45 = vadd.f32 %v500_v19, %v290_v43 }
 0x119   :  { %v652_v28 = vpop.permute.xlu1 %651  ;;  %1538 = vset.pattern.permute.xlu1 %v2374_v49  ;;  %v501_v49 = vmul.f32 %v1925_v13, %v390_v25 }
 0x11a   :  { %v750_v51 = vadd.f32 %v652_v28, %v558_v39  ;;  %v751_v7 = vadd.f32 %v652_v28, %v559_v0  ;;  %445 = vperm.xlu1 %1538, %v50_v38  }
 0x11b   :  { %v565_v4 = vadd.f32 %v501_v49, %v291_v14 }
 0x11c   :  { %v814_v27 = vmax.f32 %v750_v51, 0.0  ;;  %v815_v24 = vmax.f32 %v751_v7, 0.0 }
 0x11d   :  { %v757_v52 = vadd.f32 %v664_v10, %v565_v4  ;;  %v506_v4 = vmul.f32 %v1923_v12, %v1903_v59 }
 0x11e   :  { %v170_v61 = vpop.permute.xlu1 %169  ;;  %v865_v32 = vpack.c.bf16 %v817_v54, %v815_v24  ;;  %v864_v60 = vpack.c.bf16 %v816_v58, %v814_v27  ;;  %1539 = vset.pattern.permute.xlu1 %v2375_v15  ;;  %v499_v15 = vmul.f32 %v1925_v13, %v1888_v53 }
 0x11f   :  { %707 = vperm.xlu1 %1539, %v1766_v21   ;;  %v288_v21 = vmul.f32 %v1929_v16, %v160_v44  ;;  %v821_v1 = vmax.f32 %v757_v52, 0.0  ;;  %v1552_v44 = vld [vmem:[%s2356_s2 + $0x4] ss:$8 sps:$4 sm:$0xff]   ;;  %v292_v40 = vmul.f32 %v1929_v16, %v170_v61  ;;  %v293_v55 = vmul.f32 %v1931_v22, %v170_v61 }
 0x120   :  { %1040 = vmatprep.subr.bf16.mxu0 %v865_v32  ;;  %v563_v6 = vadd.f32 %v499_v15, %v289_v62  ;;  %1058 = vmatprep.mubr.bf16.mxu0 %v1552_v44 }
 0x121   :  { %1041 = vmatpush1.bf16.msra.mxu0 %v864_v60  ;;  %v562_v57 = vadd.f32 %v498_v3, %v288_v21  ;;  %v566_v39 = vadd.f32 %v502_v20, %v292_v40 }
 0x122   :  { %v175_v2 = vpop.permute.xlu1 %174 }
 0x123   :  { %715 = vperm.xlu1 %1539, %v1775_v23   ;;  %v756_v23 = vadd.f32 %v664_v10, %v564_v45  ;;  %v294_v41 = vmul.f32 %v1929_v16, %v175_v2  ;;  %v295_v33 = vmul.f32 %v1931_v22, %v175_v2  ;;  %v680_v45 = vpop.permute.xlu0 %679 }
 0x125   :  { %v820_v36 = vmax.f32 %v756_v23, 0.0 }
 0x127   :  { %v398_v5 = vpop.permute.xlu1 %397  ;;  %719 = vperm.xlu1 %1539, %v50_v38   ;;  %v503_v38 = vmul.f32 %v1925_v13, %v1894_v56  ;;  %v688_v40 = vpop.permute.xlu0 %687 }
 0x128   :  { %v504_v37 = vmul.f32 %v1923_v12, %v398_v5  ;;  %v505_v35 = vmul.f32 %v1925_v13, %v398_v5  ;;  %v507_v5 = vmul.f32 %v1925_v13, %v1903_v59 }
 0x129   :  { %v567_v0 = vadd.f32 %v503_v38, %v293_v55  ;;  %v510_v55 = vmul.f32 %v1923_v12, %v1910_v63 }
 0x12a   :  { %v568_v26 = vadd.f32 %v504_v37, %v294_v41  ;;  %v569_v30 = vadd.f32 %v505_v35, %v295_v33 }
 0x12c   :  { %v660_v8 = vpop.permute.xlu1 %659  ;;  %v760_v29 = vadd.f32 %v672_v48, %v568_v26  ;;  %v761_v46 = vadd.f32 %v672_v48, %v569_v30  ;;  %v511_v26 = vmul.f32 %v1925_v13, %v1910_v63  ;;  %v2150_v63 = vld [vmem:[%s2355_s1] sm:$0xff] }
 0x12d   :  { %v754_v17 = vadd.f32 %v660_v8, %v562_v57  ;;  %v755_v50 = vadd.f32 %v660_v8, %v563_v6 }
 0x12e   :  { %v824_v58 = vmax.f32 %v760_v29, 0.0  ;;  %v825_v54 = vmax.f32 %v761_v46, 0.0 }
 0x12f   :  { %v818_v31 = vmax.f32 %v754_v17, 0.0  ;;  %v819_v53 = vmax.f32 %v755_v50, 0.0 }
 0x131   :  { %v180_v11 = vpop.permute.xlu1 %179  ;;  %v867_v18 = vpack.c.bf16 %v821_v1, %v819_v53  ;;  %v866_v42 = vpack.c.bf16 %v820_v36, %v818_v31 }
 0x132   :  { %v296_v14 = vmul.f32 %v1929_v16, %v180_v11  ;;  %v297_v3 = vmul.f32 %v1931_v22, %v180_v11 }
 0x133   :  { %1042 = vmatprep.subr.bf16.mxu0 %v867_v18 }
 0x134   :  { %1043 = vmatpush1.bf16.msra.mxu0 %v866_v42  ;;  %v570_v52 = vadd.f32 %v506_v4, %v296_v14  ;;  %v571_v57 = vadd.f32 %v507_v5, %v297_v3  ;;  %v2180_v4 = vld [vmem:[%s2355_s1 + $0x20] sm:$0xff]  ;;  %v2186_v5 = vld [vmem:[%s2355_s1 + $0x28] sm:$0xff] }
 0x135   :  { %v185_v34 = vpop.permute.xlu1 %184 }
 0x136   :  { %v298_v49 = vmul.f32 %v1929_v16, %v185_v34  ;;  %v299_v43 = vmul.f32 %v1931_v22, %v185_v34 }
 0x13a   :  { %v406_v25 = vpop.permute.xlu1 %405 }
 0x13b   :  { %v508_v2 = vmul.f32 %v1923_v12, %v406_v25  ;;  %v509_v19 = vmul.f32 %v1925_v13, %v406_v25 }
 0x13d   :  { %v572_v15 = vadd.f32 %v508_v2, %v298_v49  ;;  %v573_v21 = vadd.f32 %v509_v19, %v299_v43  ;;  %v2164_v19 = vld [vmem:[%s2355_s1 + $0x10] sm:$0xff]  ;;  %v2170_v49 = vld [vmem:[%s2355_s1 + $0x18] sm:$0xff] }
 0x13f   :  { %v668_v28 = vpop.permute.xlu1 %667  ;;  %v764_v10 = vadd.f32 %v680_v45, %v572_v15  ;;  %v765_v23 = vadd.f32 %v680_v45, %v573_v21 }
 0x140   :  { %v758_v51 = vadd.f32 %v668_v28, %v566_v39  ;;  %v759_v7 = vadd.f32 %v668_v28, %v567_v0 }
 0x141   :  { %v828_v50 = vmax.f32 %v764_v10, 0.0  ;;  %v829_v36 = vmax.f32 %v765_v23, 0.0  ;;  %v514_v10 = vmul.f32 %v1923_v12, %v1920_v9  ;;  %v515_v23 = vmul.f32 %v1925_v13, %v1920_v9 }
 0x142   :  { %v822_v27 = vmax.f32 %v758_v51, 0.0  ;;  %v823_v24 = vmax.f32 %v759_v7, 0.0 }
 0x144   :  { %v190_v56 = vpop.permute.xlu1 %189  ;;  %v869_v32 = vpack.c.bf16 %v825_v54, %v823_v24  ;;  %v868_v60 = vpack.c.bf16 %v824_v58, %v822_v27 }
 0x145   :  { %v300_v35 = vmul.f32 %v1929_v16, %v190_v56  ;;  %v301_v41 = vmul.f32 %v1931_v22, %v190_v56  ;;  %v1629_v56 = vmov 3  }
 0x146   :  { %1044 = vmatprep.subr.bf16.mxu0 %v869_v32  ;;  %1540 = vset.pattern.permute.xlu0 %v1629_v56  ;;  %v2156_v32 = vld [vmem:[%s2355_s1 + $0x8] sm:$0xff] }
 0x147   :  { %1045 = vmatpush1.bf16.msra.mxu0 %v868_v60  ;;  %v574_v48 = vadd.f32 %v510_v55, %v300_v35  ;;  %v575_v29 = vadd.f32 %v511_v26, %v301_v41  ;;  %1541 = vset.pattern.permute.xlu1 %v1629_v56  ;;  %v1596_v41 = vld [vmem:[%s2355_s1 + $0x50] sm:$0xff]  ;;  %v1598_v55 = vld [vmem:[%s2355_s1 + $0x60] sm:$0xff] }
 0x148   :  { %v195_v61 = vpop.permute.xlu1 %194  ;;  %883 = vperm.xlu0 %1540, %v2150_v63   ;;  %887 = vperm.xlu1 %1541, %v2156_v32  }
 0x149   :  { %v302_v34 = vmul.f32 %v1929_v16, %v195_v61  ;;  %v303_v37 = vmul.f32 %v1931_v22, %v195_v61 }
 0x14c   :  { %891 = vperm.xlu1 %1541, %v2164_v19   ;;  %895 = vperm.xlu0 %1540, %v2170_v49  }
 0x14d   :  { %v414_v62 = vpop.permute.xlu1 %413 }
 0x14e   :  { %v512_v42 = vmul.f32 %v1923_v12, %v414_v62  ;;  %v513_v59 = vmul.f32 %v1925_v13, %v414_v62 }
 0x150   :  { %v576_v33 = vadd.f32 %v512_v42, %v302_v34  ;;  %v577_v20 = vadd.f32 %v513_v59, %v303_v37  ;;  %899 = vperm.xlu1 %1541, %v2180_v4   ;;  %903 = vperm.xlu0 %1540, %v2186_v5   ;;  %v1594_v42 = vld [vmem:[%s2355_s1 + $0x40] sm:$0xff]  ;;  %v1595_v59 = vld [vmem:[%s2355_s1 + $0x48] sm:$0xff] }
 0x152   :  { %v676_v6 = vpop.permute.xlu1 %675  ;;  %v768_v30 = vadd.f32 %v688_v40, %v576_v33  ;;  %v769_v25 = vadd.f32 %v688_v40, %v577_v20  ;;  %v1597_v33 = vld [vmem:[%s2355_s1 + $0x58] sm:$0xff] }
 0x153   :  { %v762_v8 = vadd.f32 %v676_v6, %v570_v52  ;;  %v763_v17 = vadd.f32 %v676_v6, %v571_v57  ;;  %v696_v52 = vpop.permute.xlu0 %695 }
 0x154   :  { %v832_v28 = vmax.f32 %v768_v30, 0.0  ;;  %v833_v51 = vmax.f32 %v769_v25, 0.0  ;;  %v1599_v25 = vld [vmem:[%s2355_s1 + $0x68] sm:$0xff] }
 0x155   :  { %v826_v1 = vmax.f32 %v762_v8, 0.0  ;;  %v827_v31 = vmax.f32 %v763_v17, 0.0 }
 0x157   :  { %v200_v53 = vpop.permute.xlu1 %199  ;;  %v871_v44 = vpack.c.bf16 %v829_v36, %v827_v31  ;;  %v870_v11 = vpack.c.bf16 %v828_v50, %v826_v1  ;;  %v2196_v50 = vld [vmem:[%s2355_s1 + $0x30] sm:$0xff]  ;;  %v2202_v36 = vld [vmem:[%s2355_s1 + $0x38] sm:$0xff] }
 0x158   :  { %v304_v3 = vmul.f32 %v1929_v16, %v200_v53  ;;  %v305_v15 = vmul.f32 %v1931_v22, %v200_v53  ;;  %907 = vperm.xlu1 %1541, %v2196_v50   ;;  %911 = vperm.xlu0 %1540, %v2202_v36  }
 0x159   :  { %1046 = vmatprep.subr.bf16.mxu0 %v871_v44 }
 0x15a   :  { %1047 = vmatpush1.bf16.msra.mxu0 %v870_v11  ;;  %v578_v57 = vadd.f32 %v514_v10, %v304_v3  ;;  %v579_v17 = vadd.f32 %v515_v23, %v305_v15 }
 0x15b   :  { %v205_v18 = vpop.permute.xlu1 %204 }
 0x15c   :  { %v306_v43 = vmul.f32 %v1929_v16, %v205_v18  ;;  %v307_v14 = vmul.f32 %v1931_v22, %v205_v18  ;;  %915 = vperm.xlu1 %1541, %v1594_v42   ;;  %919 = vperm.xlu0 %1540, %v1595_v59  }
 0x160   :  { %v422_v38 = vpop.permute.xlu1 %421  ;;  %923 = vperm.xlu1 %1541, %v1596_v41   ;;  %927 = vperm.xlu0 %1540, %v1597_v33  }
 0x161   :  { %v516_v61 = vmul.f32 %v1923_v12, %v422_v38  ;;  %v517_v2 = vmul.f32 %v1925_v13, %v422_v38 }
 0x163   :  { %v580_v21 = vadd.f32 %v516_v61, %v306_v43  ;;  %v581_v62 = vadd.f32 %v517_v2, %v307_v14 }
 0x164   :  { %931 = vperm.xlu1 %1541, %v1598_v55   ;;  %935 = vperm.xlu0 %1540, %v1599_v25  }
 0x165   :  { %v684_v46 = vpop.permute.xlu1 %683  ;;  %v772_v6 = vadd.f32 %v696_v52, %v580_v21  ;;  %v773_v8 = vadd.f32 %v696_v52, %v581_v62 }
 0x166   :  { %v766_v39 = vadd.f32 %v684_v46, %v574_v48  ;;  %v767_v0 = vadd.f32 %v684_v46, %v575_v29 }
 0x167   :  { %v836_v53 = vmax.f32 %v772_v6, 0.0  ;;  %v837_v44 = vmax.f32 %v773_v8, 0.0 }
 0x168   :  { %v830_v7 = vmax.f32 %v766_v39, 0.0  ;;  %v831_v58 = vmax.f32 %v767_v0, 0.0 }
 0x16a   :  { %v2145_v54 = vpop.permute.xlu1 %209  ;;  %v873_v27 = vpack.c.bf16 %v833_v51, %v831_v58  ;;  %v872_v24 = vpack.c.bf16 %v832_v28, %v830_v7  ;;  %v1600_v28 = vld [vmem:[%s2355_s1 + $0x70] sm:$0xff] }
 0x16b   :  { %v308_v48 = vmul.f32 %v1929_v16, %v2145_v54  ;;  %v309_v29 = vmul.f32 %v1931_v22, %v2145_v54  ;;  %939 = vperm.xlu1 %1541, %v1600_v28   ;;  %v2377_v51 = vld [vmem:[#allocation6_spill] sm:$0xff]  ;;  %v704_v54 = vpop.permute.xlu0 %703 }
 0x16c   :  { %1048 = vmatprep.subr.bf16.mxu0 %v873_v27  ;;  %v518_v7 = vmul.f32 %v1923_v12, %v2377_v51  ;;  %v519_v58 = vmul.f32 %v1925_v13, %v2377_v51  ;;  %v1601_v27 = vld [vmem:[%s2355_s1 + $0x78] sm:$0xff] }
 0x16d   :  { %1049 = vmatpush1.bf16.msra.mxu0 %v872_v24  ;;  %943 = vperm.xlu0 %1540, %v1601_v27  }
 0x16e   :  { %v215_v60 = vpop.permute.xlu1 %214  ;;  %v583_v61 = vadd.f32 %v519_v58, %v309_v29 }
 0x16f   :  { %v310_v26 = vmul.f32 %v1929_v16, %v215_v60  ;;  %v311_v30 = vmul.f32 %v1931_v22, %v215_v60  ;;  %v582_v60 = vadd.f32 %v518_v7, %v308_v48  ;;  %v712_v59 = vpop.permute.xlu0 %711 }
 0x173   :  { %v430_v45 = vpop.permute.xlu1 %429 }
 0x174   :  { %v520_v38 = vmul.f32 %v1923_v12, %v430_v45  ;;  %v521_v40 = vmul.f32 %v1925_v13, %v430_v45 }
 0x176   :  { %v584_v46 = vadd.f32 %v520_v38, %v310_v26  ;;  %v585_v39 = vadd.f32 %v521_v40, %v311_v30 }
 0x178   :  { %v692_v9 = vpop.permute.xlu1 %691  ;;  %v776_v24 = vadd.f32 %v704_v54, %v584_v46  ;;  %v777_v56 = vadd.f32 %v704_v54, %v585_v39 }
 0x179   :  { %v770_v1 = vadd.f32 %v692_v9, %v578_v57  ;;  %v771_v31 = vadd.f32 %v692_v9, %v579_v17 }
 0x17a   :  { %v841_v21 = vmax.f32 %v777_v56, 0.0  ;;  %v840_v62 = vmax.f32 %v776_v24, 0.0 }
 0x17b   :  { %v834_v11 = vmax.f32 %v770_v1, 0.0  ;;  %v835_v18 = vmax.f32 %v771_v31, 0.0 }
 0x17d   :  { %v220_v34 = vpop.permute.xlu1 %219  ;;  %v875_v37 = vpack.c.bf16 %v837_v44, %v835_v18  ;;  %v874_v35 = vpack.c.bf16 %v836_v53, %v834_v11  ;;  %v2378_v11 = vld [vmem:[#allocation7_spill] sm:$0xff] }
 0x17e   :  { %v312_v31 = vmul.f32 %v1929_v16, %v220_v34  ;;  %v313_v53 = vmul.f32 %v1931_v22, %v220_v34  ;;  %v522_v18 = vmul.f32 %v1923_v12, %v2378_v11  ;;  %v523_v42 = vmul.f32 %v1925_v13, %v2378_v11  ;;  %v2379_v34 = vld [vmem:[#allocation8_spill] sm:$0xff] }
 0x17f   :  { %1050 = vmatprep.subr.bf16.mxu0 %v875_v37  ;;  %v526_v30 = vmul.f32 %v1923_v12, %v2379_v34  ;;  %v527_v25 = vmul.f32 %v1925_v13, %v2379_v34  ;;  %v1571_v11 = vld [vmem:[%s2356_s2 + $0x74] ss:$8 sps:$4 sm:$0xff]  }
 0x180   :  { %1051 = vmatpush1.bf16.msra.mxu0 %v874_v35  ;;  %v586_v41 = vadd.f32 %v522_v18, %v312_v31  ;;  %v587_v33 = vadd.f32 %v523_v42, %v313_v53  ;;  %v1567_v31 = vld [vmem:[%s2356_s2 + $0x50] ss:$8 sps:$4 sm:$0xff]   ;;  %v1568_v53 = vld [vmem:[%s2356_s2 + $0x64] ss:$8 sps:$4 sm:$0xff]   ;;  %v1630_v42 = vmov 4  }
 0x181   :  { %v225_v20 = vpop.permute.xlu1 %224  ;;  %v1573_v18 = vld [vmem:[%s2356_s2 + $0x70] ss:$8 sps:$4 sm:$0xff]   ;;  %1542 = vset.pattern.permute.xlu1 %v1630_v42  ;;  %1543 = vset.pattern.permute.xlu0 %v1630_v42 }
 0x182   :  { %v314_v8 = vmul.f32 %v1929_v16, %v225_v20  ;;  %v315_v17 = vmul.f32 %v1931_v22, %v225_v20  ;;  %1188 = vperm.xlu1 %1542, %v2150_v63   ;;  %1192 = vperm.xlu0 %1543, %v2156_v32  }
 0x186   :  { %v438_v0 = vpop.permute.xlu1 %437  ;;  %1196 = vperm.xlu1 %1542, %v2164_v19  }
 0x187   :  { %v524_v52 = vmul.f32 %v1923_v12, %v438_v0  ;;  %v525_v57 = vmul.f32 %v1925_v13, %v438_v0 }
 0x189   :  { %v588_v9 = vadd.f32 %v524_v52, %v314_v8  ;;  %v589_v1 = vadd.f32 %v525_v57, %v315_v17  ;;  %v1556_v52 = vld [vmem:[%s2356_s2 + $0x24] ss:$8 sps:$4 sm:$0xff]   ;;  %v1558_v57 = vld [vmem:[%s2356_s2 + $0x20] ss:$8 sps:$4 sm:$0xff]   ;;  %v1561_v8 = vld [vmem:[%s2356_s2 + $0x30] ss:$8 sps:$4 sm:$0xff]  }
 0x18a   :  { %v1562_v17 = vld [vmem:[%s2356_s2 + $0x44] ss:$8 sps:$4 sm:$0xff]   ;;  %1200 = vperm.xlu1 %1542, %v2170_v49  }
 0x18b   :  { %v700_v2 = vpop.permute.xlu1 %699  ;;  %v780_v37 = vadd.f32 %v712_v59, %v588_v9  ;;  %v781_v35 = vadd.f32 %v712_v59, %v589_v1  ;;  %v1564_v9 = vld [vmem:[%s2356_s2 + $0x40] ss:$8 sps:$4 sm:$0xff]   ;;  %v1565_v1 = vld [vmem:[%s2356_s2 + $0x54] ss:$8 sps:$4 sm:$0xff]   ;;  %v1631_v59 = vmov 5  }
 0x18c   :  { %v774_v43 = vadd.f32 %v700_v2, %v582_v60  ;;  %v775_v14 = vadd.f32 %v700_v2, %v583_v61  ;;  %1544 = vset.pattern.permute.xlu0 %v1631_v59 }
 0x18d   :  { %v845_v48 = vmax.f32 %v781_v35, 0.0  ;;  %v844_v29 = vmax.f32 %v780_v37, 0.0  ;;  %1333 = vperm.xlu0 %1544, %v2150_v63   ;;  %v1632_v63 = vmov 6  }
 0x18e   :  { %v838_v3 = vmax.f32 %v774_v43, 0.0  ;;  %v839_v15 = vmax.f32 %v775_v14, 0.0  ;;  %1545 = vset.pattern.permute.xlu1 %v1631_v59 }
 0x18f   :  { %1337 = vperm.xlu1 %1545, %v2156_v32  }
 0x190   :  { %v230_v45 = vpop.permute.xlu1 %229  ;;  %v877_v10 = vpack.c.bf16 %v841_v21, %v839_v15  ;;  %v876_v23 = vpack.c.bf16 %v840_v62, %v838_v3 }
 0x191   :  { %v316_v20 = vmul.f32 %v1929_v16, %v230_v45  ;;  %v317_v38 = vmul.f32 %v1931_v22, %v230_v45  ;;  %1341 = vperm.xlu0 %1544, %v2164_v19  }
 0x192   :  { %1052 = vmatprep.subr.bf16.mxu0 %v877_v10 }
 0x193   :  { %1053 = vmatpush1.bf16.msra.mxu0 %v876_v23  ;;  %v590_v7 = vadd.f32 %v526_v30, %v316_v20  ;;  %v591_v58 = vadd.f32 %v527_v25, %v317_v38  ;;  %v1555_v23 = vld [vmem:[%s2356_s2 + $0x10] ss:$8 sps:$4 sm:$0xff]   ;;  %1546 = vset.pattern.permute.xlu1 %v1630_v42 }
 0x194   :  { %v235_v6 = vpop.permute.xlu1 %234  ;;  %1204 = vperm.xlu1 %1546, %v2180_v4  }
 0x195   :  { %v318_v27 = vmul.f32 %v1929_v16, %v235_v6  ;;  %v319_v54 = vmul.f32 %v1931_v22, %v235_v6  ;;  %v1550_v16 = vld [vmem:[%s2356_s2] ss:$8 sps:$4 sm:$0xff]   ;;  %v1553_v22 = vld [vmem:[%s2356_s2 + $0x14] ss:$8 sps:$4 sm:$0xff]   ;;  %1345 = vperm.xlu0 %1544, %v2170_v49  }
 0x196   :  { %v1559_v6 = vld [vmem:[%s2356_s2 + $0x34] ss:$8 sps:$4 sm:$0xff]  }
 0x198   :  { %1208 = vperm.xlu1 %1546, %v2186_v5  }
 0x199   :  { %v446_v44 = vpop.permute.xlu1 %445  ;;  %1349 = vperm.xlu0 %1544, %v2180_v4  }
 0x19a   :  { %v528_v46 = vmul.f32 %v1923_v12, %v446_v44  ;;  %v529_v39 = vmul.f32 %v1925_v13, %v446_v44  ;;  %v1570_v44 = vld [vmem:[%s2356_s2 + $0x60] ss:$8 sps:$4 sm:$0xff]  }
 0x19c   :  { %v592_v2 = vadd.f32 %v528_v46, %v318_v27  ;;  %v593_v43 = vadd.f32 %v529_v39, %v319_v54  ;;  %1212 = vperm.xlu1 %1546, %v2196_v50  }
 0x19d   :  { %1353 = vperm.xlu0 %1544, %v2186_v5  }
 0x19e   :  { %v708_v40 = vpop.permute.xlu1 %707 }
 0x19f   :  { %v778_v55 = vadd.f32 %v708_v40, %v586_v41  ;;  %v779_v26 = vadd.f32 %v708_v40, %v587_v33 }
 0x1a0   :  { %1216 = vperm.xlu1 %1546, %v2202_v36  }
 0x1a1   :  { %v842_v0 = vmax.f32 %v778_v55, 0.0  ;;  %v843_v28 = vmax.f32 %v779_v26, 0.0  ;;  %1361 = vperm.xlu0 %1544, %v2202_v36   ;;  %v51_v55 = vld [vmem:[%s2355_s1] sm:$0x1] }
 0x1a2   :  { %v716_v51 = vpop.permute.xlu1 %715 }
 0x1a3   :  { %v879_v24 = vpack.c.bf16 %v845_v48, %v843_v28  ;;  %v878_v56 = vpack.c.bf16 %v844_v29, %v842_v0  ;;  %v782_v60 = vadd.f32 %v716_v51, %v590_v7  ;;  %v783_v61 = vadd.f32 %v716_v51, %v591_v58 }
 0x1a4   :  { %1547 = vset.pattern.permute.xlu1 %v1631_v59 }
 0x1a5   :  { %1054 = vmatprep.subr.bf16.mxu0 %v879_v24  ;;  %v846_v3 = vmax.f32 %v782_v60, 0.0  ;;  %v847_v15 = vmax.f32 %v783_v61, 0.0  ;;  %1549 = vset.pattern.permute.xlu0 %v1632_v63 }
 0x1a6   :  { %v720_v14 = vpop.permute.xlu1 %719  ;;  %1055 = vmatpush1.bf16.msra.mxu0 %v878_v56  ;;  %1357 = vperm.xlu1 %1547, %v2196_v50  }
 0x1a7   :  { %v784_v12 = vadd.f32 %v720_v14, %v592_v2  ;;  %v785_v13 = vadd.f32 %v720_v14, %v593_v43 }
 0x1a9   :  { %v848_v21 = vmax.f32 %v784_v12, 0.0  ;;  %v849_v62 = vmax.f32 %v785_v13, 0.0 }
 0x1aa   :  { %1548 = vset.pattern.permute.xlu1 %v1632_v63 }
 0x1ab   :  { %v881_v45 = vpack.c.bf16 %v849_v62, %v847_v15  ;;  %v880_v10 = vpack.c.bf16 %v848_v21, %v846_v3  ;;  %1408 = vperm.xlu1 %1548, %v51_v55  }
 0x1ad   :  { %1056 = vmatprep.subr.bf16.mxu0 %v881_v45 }
 0x1ae   :  { %1057 = vmatpush1.bf16.msra.mxu0 %v880_v10 }
 0x1b1   :  { %1059 = vmatmul.mubr.bf16.vlgmr.msra.gmra.mrb[0].mxu0 %v1550_v16 }
 0x1b2   :  { %1068 = vmatprep.mubr.bf16.mxu0 %v1553_v22 }
 0x1b9   :  { %1069 = vmatmul.mubr.bf16.gmra.mrb[4].mxu0 %v1555_v23 }
 0x1ba   :  { %1078 = vmatprep.mubr.bf16.mxu0 %v1556_v52 }
 0x1c1   :  { %1079 = vmatmul.mubr.bf16.gmra.mrb[8].mxu0 %v1558_v57 }
 0x1c2   :  { %1088 = vmatprep.mubr.bf16.mxu0 %v1559_v6 }
 0x1c7   :  { %v884_v19 = vpop.permute.xlu0 %883  ;;  %v888_v49 = vpop.permute.xlu1 %887 }
 0x1c9   :  { %1089 = vmatmul.mubr.bf16.gmra.mrb[12].mxu0 %v1561_v8 }
 0x1ca   :  { %1098 = vmatprep.mubr.bf16.mxu0 %v1562_v17 }
 0x1cb   :  { %v892_v34 = vpop.permute.xlu1 %891  ;;  %v896_v39 = vpop.permute.xlu0 %895 }
 0x1cf   :  { %v900_v60 = vpop.permute.xlu1 %899  ;;  %v904_v12 = vpop.permute.xlu0 %903 }
 0x1d1   :  { %1099 = vmatmul.mubr.bf16.gmra.mrb[16].mxu0 %v1564_v9 }
 0x1d2   :  { %1108 = vmatprep.mubr.bf16.mxu0 %v1565_v1 }
 0x1d7   :  { %v908_v52 = vpop.permute.xlu1 %907  ;;  %v912_v9 = vpop.permute.xlu0 %911 }
 0x1d9   :  { %1109 = vmatmul.mubr.bf16.gmra.mrb[20].mxu0 %v1567_v31 }
 0x1da   :  { %1118 = vmatprep.mubr.bf16.mxu0 %v1568_v53 }
 0x1e1   :  { %1119 = vmatmul.mubr.bf16.gmra.mrb[24].mxu0 %v1570_v44 }
 0x1e2   :  { %1128 = vmatprep.mubr.bf16.mxu0 %v1571_v11 }
 0x1e9   :  { %1129 = vmatmul.mubr.bf16.gmra.mrb[28].mxu0 %v1573_v18 }
 0x284   :  { %v1060_v32 = vpop.f32.mrb[0].mxu0 }
 0x285   :  { %v1061_v37 = vadd.f32 %v1060_v32, %v884_v19  ;;  %v1062_v35 = vpop.f32.mrb[1].mxu0  ;;  %v916_v32 = vpop.permute.xlu1 %915 }
 0x286   :  { %v1063_v41 = vadd.f32 %v1062_v35, %v884_v19  ;;  %v1064_v33 = vpop.f32.mrb[2].mxu0 }
 0x287   :  { %v1065_v4 = vadd.f32 %v1064_v33, %v888_v49  ;;  %v1066_v20 = vpop.f32.mrb[3].mxu0  ;;  %v1139_v38 = vmax.f32 %v1061_v37, 0.0  ;;  %v920_v33 = vpop.permute.xlu0 %919 }
 0x288   :  { %v1067_v5 = vadd.f32 %v1066_v20, %v888_v49  ;;  %v1140_v26 = vmax.f32 %v1063_v41, 0.0 }
 0x289   :  { %v1141_v40 = vmax.f32 %v1065_v4, 0.0 }
 0x28a   :  { %v1142_v36 = vmax.f32 %v1067_v5, 0.0 }
 0x28b   :  { %v1171_v30 = vpack.c.bf16 %v1141_v40, %v1139_v38 }
 0x28c   :  { %v1070_v25 = vpop.f32.mrb[4].mxu0  ;;  %v1172_v48 = vpack.c.bf16 %v1142_v36, %v1140_v26 }
 0x28d   :  { %v1071_v29 = vadd.f32 %v1070_v25, %v892_v34  ;;  %v1072_v46 = vpop.f32.mrb[5].mxu0  ;;  %v924_v25 = vpop.permute.xlu1 %923 }
 0x28e   :  { %v1073_v0 = vadd.f32 %v1072_v46, %v892_v34  ;;  %v1074_v50 = vpop.f32.mrb[6].mxu0  ;;  %1243 = vmatprep.subr.bf16.mxu1 %v1172_v48 }
 0x28f   :  { %v1075_v28 = vadd.f32 %v1074_v50, %v896_v39  ;;  %v1076_v51 = vpop.f32.mrb[7].mxu0  ;;  %1244 = vmatpush1.bf16.msra.mxu1 %v1171_v30  ;;  %v1143_v58 = vmax.f32 %v1071_v29, 0.0 }
 0x290   :  { %v1077_v7 = vadd.f32 %v1076_v51, %v896_v39  ;;  %v1144_v54 = vmax.f32 %v1073_v0, 0.0  ;;  %v928_v0 = vpop.permute.xlu0 %927 }
 0x291   :  { %v1145_v27 = vmax.f32 %v1075_v28, 0.0 }
 0x292   :  { %v1146_v24 = vmax.f32 %v1077_v7, 0.0 }
 0x293   :  { %v1173_v56 = vpack.c.bf16 %v1145_v27, %v1143_v58 }
 0x294   :  { %v1174_v61 = vpack.c.bf16 %v1146_v24, %v1144_v54  ;;  %v1080_v2 = vpop.f32.mrb[8].mxu0 }
 0x295   :  { %v1081_v43 = vadd.f32 %v1080_v2, %v900_v60  ;;  %v1082_v14 = vpop.f32.mrb[9].mxu0 }
 0x296   :  { %v1083_v13 = vadd.f32 %v1082_v14, %v900_v60  ;;  %v1084_v3 = vpop.f32.mrb[10].mxu0  ;;  %1245 = vmatprep.subr.bf16.mxu1 %v1174_v61  ;;  %v932_v61 = vpop.permute.xlu1 %931 }
 0x297   :  { %v1085_v15 = vadd.f32 %v1084_v3, %v904_v12  ;;  %v1086_v21 = vpop.f32.mrb[11].mxu0  ;;  %1246 = vmatpush1.bf16.msra.mxu1 %v1173_v56  ;;  %v1147_v45 = vmax.f32 %v1081_v43, 0.0 }
 0x298   :  { %v1087_v62 = vadd.f32 %v1086_v21, %v904_v12  ;;  %v1148_v16 = vmax.f32 %v1083_v13, 0.0  ;;  %v936_v13 = vpop.permute.xlu0 %935 }
 0x299   :  { %v1149_v10 = vmax.f32 %v1085_v15, 0.0 }
 0x29a   :  { %v1150_v22 = vmax.f32 %v1087_v62, 0.0 }
 0x29b   :  { %v1175_v23 = vpack.c.bf16 %v1149_v10, %v1147_v45 }
 0x29c   :  { %v1176_v57 = vpack.c.bf16 %v1150_v22, %v1148_v16  ;;  %v1090_v6 = vpop.f32.mrb[12].mxu0 }
 0x29d   :  { %v1091_v8 = vadd.f32 %v1090_v6, %v908_v52  ;;  %v1092_v17 = vpop.f32.mrb[13].mxu0 }
 0x29e   :  { %v1093_v1 = vadd.f32 %v1092_v17, %v908_v52  ;;  %v1094_v31 = vpop.f32.mrb[14].mxu0  ;;  %1247 = vmatprep.subr.bf16.mxu1 %v1176_v57  ;;  %v940_v57 = vpop.permute.xlu1 %939 }
 0x29f   :  { %v1095_v53 = vadd.f32 %v1094_v31, %v912_v9  ;;  %v1096_v44 = vpop.f32.mrb[15].mxu0  ;;  %1248 = vmatpush1.bf16.msra.mxu1 %v1175_v23  ;;  %v1151_v18 = vmax.f32 %v1091_v8, 0.0 }
 0x2a0   :  { %v1097_v11 = vadd.f32 %v1096_v44, %v912_v9  ;;  %v1152_v59 = vmax.f32 %v1093_v1, 0.0  ;;  %v944_v1 = vpop.permute.xlu0 %943 }
 0x2a1   :  { %v1153_v42 = vmax.f32 %v1095_v53, 0.0 }
 0x2a2   :  { %v1154_v63 = vmax.f32 %v1097_v11, 0.0 }
 0x2a3   :  { %v1177_v19 = vpack.c.bf16 %v1153_v42, %v1151_v18 }
 0x2a4   :  { %v1178_v49 = vpack.c.bf16 %v1154_v63, %v1152_v59  ;;  %v1100_v37 = vpop.f32.mrb[16].mxu0 }
 0x2a5   :  { %v1101_v35 = vadd.f32 %v1100_v37, %v916_v32  ;;  %v1102_v41 = vpop.f32.mrb[17].mxu0  ;;  %v1574_v37 = vld [vmem:[%s2357_s3] sm:$0xff]  }
 0x2a6   :  { %v1103_v4 = vadd.f32 %v1102_v41, %v916_v32  ;;  %v1104_v20 = vpop.f32.mrb[18].mxu0  ;;  %1249 = vmatprep.subr.bf16.mxu1 %v1178_v49  ;;  %v1576_v41 = vld [vmem:[%s2357_s3 + $0x10] sm:$0xff]  }
 0x2a7   :  { %v1105_v5 = vadd.f32 %v1104_v20, %v920_v33  ;;  %v1106_v38 = vpop.f32.mrb[19].mxu0  ;;  %1250 = vmatpush1.bf16.msra.mxu1 %v1177_v19  ;;  %v1155_v55 = vmax.f32 %v1101_v35, 0.0  ;;  %v1575_v35 = vld [vmem:[%s2357_s3 + $0x8] sm:$0xff]  }
 0x2a8   :  { %v1107_v40 = vadd.f32 %v1106_v38, %v920_v33  ;;  %v1156_v36 = vmax.f32 %v1103_v4, 0.0  ;;  %v1577_v33 = vld [vmem:[%s2357_s3 + $0x18] sm:$0xff]   ;;  %v1189_v4 = vpop.permute.xlu1 %1188  ;;  %s1634_s3 = smov [#allocation2]  }
 0x2a9   :  { %v1157_v26 = vmax.f32 %v1105_v5, 0.0  ;;  %v1193_v5 = vpop.permute.xlu0 %1192  ;;  %s1454_s20 = sshll.u32 %s1634_s3, 4  ;;  %s1455_s20 = int_to_ptr.vmem [resolvable:$true] %s1454_s20 }
 0x2aa   :  { %v1158_v34 = vmax.f32 %v1107_v40, 0.0  ;;  %s1602_s21 = scalar_lea.vmem %s1455_s20, 32  ;;  %p1607_p1 = scmp.lt.s32.totalorder %s1455_s20, %s1455_s20 }
 0x2ab   :  { %v1179_v30 = vpack.c.bf16 %v1157_v26, %v1155_v55  ;;  %p1603_p0 = scmp.ne.s32.totalorder %s1455_s20, %s1602_s21  ;;  %p1608_p2 = scmp.lt.s32.totalorder %s1602_s21, %s1602_s21 }
 0x2ac   :  { %v1180_v48 = vpack.c.bf16 %v1158_v34, %v1156_v36  ;;  %v1110_v29 = vpop.f32.mrb[20].mxu0  ;;  %v1197_v20 = vpop.permute.xlu1 %1196 }
 0x2ad   :  { %v1111_v46 = vadd.f32 %v1110_v29, %v924_v25  ;;  %v1112_v39 = vpop.f32.mrb[21].mxu0  ;;  %v1334_v40 = vpop.permute.xlu0 %1333  ;;  %p1609_p3 = por %p1608_p2, %p1607_p1 }
 0x2ae   :  { %v1113_v50 = vadd.f32 %v1112_v39, %v924_v25  ;;  %v1114_v28 = vpop.f32.mrb[22].mxu0  ;;  %1251 = vmatprep.subr.bf16.mxu1 %v1180_v48 }
 0x2af   :  { %v1115_v51 = vadd.f32 %v1114_v28, %v928_v0  ;;  %v1116_v7 = vpop.f32.mrb[23].mxu0  ;;  %1252 = vmatpush1.bf16.msra.mxu1 %v1179_v30  ;;  %v1159_v27 = vmax.f32 %v1111_v46, 0.0  ;;  %p1610_p4 = pnand %p1609_p3, %p1603_p0 }
 0x2b0   :  { %v1117_v58 = vadd.f32 %v1116_v7, %v928_v0  ;;  %v1160_v24 = vmax.f32 %v1113_v50, 0.0  ;;  %v1201_v38 = vpop.permute.xlu1 %1200 }
 0x2b1   :  { %v1161_v54 = vmax.f32 %v1115_v51, 0.0  ;;  %v1342_v48 = vpop.permute.xlu0 %1341 }
 0x2b2   :  { %v1162_v56 = vmax.f32 %v1117_v58, 0.0 }
 0x2b3   :  { %v1181_v60 = vpack.c.bf16 %v1161_v54, %v1159_v27 }
 0x2b4   :  { %v1182_v2 = vpack.c.bf16 %v1162_v56, %v1160_v24  ;;  %v1120_v43 = vpop.f32.mrb[24].mxu0  ;;  %v1338_v55 = vpop.permute.xlu1 %1337 }
 0x2b5   :  { %v1121_v14 = vadd.f32 %v1120_v43, %v932_v61  ;;  %v1122_v12 = vpop.f32.mrb[25].mxu0  ;;  %v1346_v56 = vpop.permute.xlu0 %1345 }
 0x2b6   :  { %v1123_v3 = vadd.f32 %v1122_v12, %v932_v61  ;;  %v1124_v15 = vpop.f32.mrb[26].mxu0  ;;  %1253 = vmatprep.subr.bf16.mxu1 %v1182_v2 }
 0x2b7   :  { %v1125_v21 = vadd.f32 %v1124_v15, %v936_v13  ;;  %v1126_v62 = vpop.f32.mrb[27].mxu0  ;;  %1254 = vmatpush1.bf16.msra.mxu1 %v1181_v60  ;;  %v1163_v10 = vmax.f32 %v1121_v14, 0.0 }
 0x2b8   :  { %v1127_v45 = vadd.f32 %v1126_v62, %v936_v13  ;;  %v1164_v22 = vmax.f32 %v1123_v3, 0.0  ;;  %v1205_v39 = vpop.permute.xlu1 %1204 }
 0x2b9   :  { %v1165_v16 = vmax.f32 %v1125_v21, 0.0 }
 0x2ba   :  { %v1166_v23 = vmax.f32 %v1127_v45, 0.0 }
 0x2bb   :  { %v1183_v52 = vpack.c.bf16 %v1165_v16, %v1163_v10 }
 0x2bc   :  { %v1184_v6 = vpack.c.bf16 %v1166_v23, %v1164_v22  ;;  %v1130_v8 = vpop.f32.mrb[28].mxu0  ;;  %v1209_v14 = vpop.permute.xlu1 %1208 }
 0x2bd   :  { %v1131_v17 = vadd.f32 %v1130_v8, %v940_v57  ;;  %v1132_v9 = vpop.f32.mrb[29].mxu0 }
 0x2be   :  { %v1133_v31 = vadd.f32 %v1132_v9, %v940_v57  ;;  %v1134_v53 = vpop.f32.mrb[30].mxu0  ;;  %1255 = vmatprep.subr.bf16.mxu1 %v1184_v6 }
 0x2bf   :  { %v1135_v44 = vadd.f32 %v1134_v53, %v944_v1  ;;  %v1136_v11 = vpop.f32.mrb[31].mxu0  ;;  %1256 = vmatpush1.bf16.msra.mxu1 %v1183_v52  ;;  %v1167_v42 = vmax.f32 %v1131_v17, 0.0  ;;  %v1350_v52 = vpop.permute.xlu0 %1349 }
 0x2c0   :  { %v1137_v18 = vadd.f32 %v1136_v11, %v944_v1  ;;  %v1168_v63 = vmax.f32 %v1133_v31, 0.0  ;;  %v1213_v8 = vpop.permute.xlu1 %1212 }
 0x2c1   :  { %v1169_v59 = vmax.f32 %v1135_v44, 0.0 }
 0x2c2   :  { %v1170_v19 = vmax.f32 %v1137_v18, 0.0 }
 0x2c3   :  { %v1185_v32 = vpack.c.bf16 %v1169_v59, %v1167_v42 }
 0x2c4   :  { %v1186_v49 = vpack.c.bf16 %v1170_v19, %v1168_v63 }
 0x2c6   :  { %1257 = vmatprep.subr.bf16.mxu1 %v1186_v49 }
 0x2c7   :  { %1258 = vmatpush1.bf16.msra.mxu1 %v1185_v32 }
 0x2ca   :  { %1276 = vmatmul.mubr.bf16.vlgmr.msra.gmra.mrb[0].mxu1 %v1574_v37 }
 0x2cb   :  { %1285 = vmatprep.mubr.bf16.mxu1 %v2376_v47 }
 0x2d2   :  { %1286 = vmatmul.mubr.bf16.gmra.mrb[4].mxu1 %v1575_v35 }
 0x2d3   :  { %1295 = vmatprep.mubr.bf16.mxu1 %v2376_v47 }
 0x2da   :  { %1296 = vmatmul.mubr.bf16.gmra.mrb[8].mxu1 %v1576_v41  ;;  %v1354_v41 = vpop.permute.xlu0 %1353 }
 0x2db   :  { %1305 = vmatprep.mubr.bf16.mxu1 %v2376_v47 }
 0x2e2   :  { %1306 = vmatmul.mubr.bf16.gmra.mrb[12].mxu1 %v1577_v33  ;;  %v1217_v33 = vpop.permute.xlu1 %1216 }
 0x39d   :  { %v1277_v26 = vpop.f32.mrb[0].mxu1 }
 0x39e   :  { %v1278_v36 = vadd.f32 %v1277_v26, %v1189_v4  ;;  %v1279_v34 = vpop.f32.mrb[1].mxu1 }
 0x39f   :  { %v1280_v30 = vadd.f32 %v1279_v34, %v1189_v4  ;;  %v1281_v25 = vpop.f32.mrb[2].mxu1 }
 0x3a0   :  { %v1316_v29 = vmax.f32 %v1278_v36, 0.0  ;;  %v1282_v46 = vadd.f32 %v1281_v25, %v1193_v5  ;;  %v1283_v47 = vpop.f32.mrb[3].mxu1 }
 0x3a1   :  { %v1317_v0 = vmax.f32 %v1280_v30, 0.0  ;;  %v1284_v50 = vadd.f32 %v1283_v47, %v1193_v5 }
 0x3a2   :  { %v1318_v28 = vmax.f32 %v1282_v46, 0.0  ;;  %v1364_v7 = vmul.f32 %v1334_v40, %v1316_v29  ;;  %v1358_v46 = vpop.permute.xlu1 %1357 }
 0x3a3   :  { %v1319_v51 = vmax.f32 %v1284_v50, 0.0  ;;  %v1365_v27 = vmul.f32 %v1334_v40, %v1317_v0 }
 0x3a4   :  { %v1366_v58 = vmul.f32 %v1338_v55, %v1318_v28 }
 0x3a5   :  { %v1367_v54 = vmul.f32 %v1338_v55, %v1319_v51  ;;  %v1287_v24 = vpop.f32.mrb[4].mxu1 }
 0x3a6   :  { %v1380_v60 = vadd.f32 %v1366_v58, %v1364_v7  ;;  %v1288_v61 = vadd.f32 %v1287_v24, %v1197_v20  ;;  %v1289_v2 = vpop.f32.mrb[5].mxu1  ;;  %v1362_v58 = vpop.permute.xlu0 %1361 }
 0x3a7   :  { %v1393_v43 = vadd.f32 %v1367_v54, %v1365_v27  ;;  %v1290_v12 = vadd.f32 %v1289_v2, %v1197_v20  ;;  %v1291_v13 = vpop.f32.mrb[6].mxu1 }
 0x3a8   :  { %v1320_v3 = vmax.f32 %v1288_v61, 0.0  ;;  %v1292_v15 = vadd.f32 %v1291_v13, %v1201_v38  ;;  %v1293_v21 = vpop.f32.mrb[7].mxu1 }
 0x3a9   :  { %v1321_v62 = vmax.f32 %v1290_v12, 0.0  ;;  %v1294_v45 = vadd.f32 %v1293_v21, %v1201_v38 }
 0x3aa   :  { %v1368_v10 = vmul.f32 %v1342_v48, %v1320_v3  ;;  %v1322_v16 = vmax.f32 %v1292_v15, 0.0 }
 0x3ab   :  { %v1369_v22 = vmul.f32 %v1342_v48, %v1321_v62  ;;  %v1323_v23 = vmax.f32 %v1294_v45, 0.0 }
 0x3ac   :  { %v1381_v57 = vadd.f32 %v1380_v60, %v1368_v10  ;;  %v1370_v6 = vmul.f32 %v1346_v56, %v1322_v16  ;;  %v1409_v16 = vpop.permute.xlu1 %1408 }
 0x3ad   :  { %v1394_v17 = vadd.f32 %v1393_v43, %v1369_v22  ;;  %v1371_v9 = vmul.f32 %v1346_v56, %v1323_v23  ;;  %v1297_v1 = vpop.f32.mrb[8].mxu1 }
 0x3ae   :  { %v1382_v31 = vadd.f32 %v1381_v57, %v1370_v6  ;;  %v1298_v53 = vadd.f32 %v1297_v1, %v1205_v39  ;;  %v1299_v44 = vpop.f32.mrb[9].mxu1 }
 0x3af   :  { %v1395_v11 = vadd.f32 %v1394_v17, %v1371_v9  ;;  %v1300_v18 = vadd.f32 %v1299_v44, %v1205_v39  ;;  %v1301_v42 = vpop.f32.mrb[10].mxu1 }
 0x3b0   :  { %v1324_v59 = vmax.f32 %v1298_v53, 0.0  ;;  %v1302_v63 = vadd.f32 %v1301_v42, %v1209_v14  ;;  %v1303_v19 = vpop.f32.mrb[11].mxu1 }
 0x3b1   :  { %v1325_v32 = vmax.f32 %v1300_v18, 0.0  ;;  %v1304_v49 = vadd.f32 %v1303_v19, %v1209_v14  ;;  %v1633_v18 = vmov 1966171168   ;;  %v2380_v19 = vld [vmem:[#allocation5_spill] sm:$0xff] }
 0x3b2   :  { %v1372_v37 = vmul.f32 %v1350_v52, %v1324_v59  ;;  %v1326_v35 = vmax.f32 %v1302_v63, 0.0  ;;  %v1429_v42 = vunpack.c.l.s4 %v1633_v18 }
 0x3b3   :  { %v1373_v4 = vmul.f32 %v1350_v52, %v1325_v32  ;;  %v1327_v20 = vmax.f32 %v1304_v49, 0.0 }
 0x3b4   :  { %v1383_v5 = vadd.f32 %v1382_v31, %v1372_v37  ;;  %v1374_v38 = vmul.f32 %v1354_v41, %v1326_v35  ;;  %v1430_v59 = vunpack.c.0.s8 %v1429_v42 }
 0x3b5   :  { %v1396_v40 = vadd.f32 %v1395_v11, %v1373_v4  ;;  %v1375_v55 = vmul.f32 %v1354_v41, %v1327_v20  ;;  %v1307_v26 = vpop.f32.mrb[12].mxu1  ;;  %v2381_v41 = vlaneseq }
 0x3b6   :  { %v1384_v36 = vadd.f32 %v1383_v5, %v1374_v38  ;;  %v1308_v34 = vadd.f32 %v1307_v26, %v1213_v8  ;;  %v1309_v30 = vpop.f32.mrb[13].mxu1  ;;  %v1433_v32 = vsub.s32 %v1430_v59, %v2380_v19 }
 0x3b7   :  { %v1397_v25 = vadd.f32 %v1396_v40, %v1375_v55  ;;  %v1310_v48 = vadd.f32 %v1309_v30, %v1213_v8  ;;  %v1311_v29 = vpop.f32.mrb[14].mxu1  ;;  %vm1445_vm0 = vcmp.lt.s32.totalorder %v2381_v41, 256 }
 0x3b8   :  { %v1328_v47 = vmax.f32 %v1308_v34, 0.0  ;;  %v1312_v39 = vadd.f32 %v1311_v29, %v1217_v33  ;;  %v1313_v0 = vpop.f32.mrb[15].mxu1 }
 0x3b9   :  { %v1329_v50 = vmax.f32 %v1310_v48, 0.0  ;;  %v1314_v28 = vadd.f32 %v1313_v0, %v1217_v33 }
 0x3ba   :  { %v1330_v51 = vmax.f32 %v1312_v39, 0.0  ;;  %v1376_v7 = vmul.f32 %v1358_v46, %v1328_v47 }
 0x3bb   :  { %v1331_v27 = vmax.f32 %v1314_v28, 0.0  ;;  %v1377_v54 = vmul.f32 %v1358_v46, %v1329_v50 }
 0x3bc   :  { %v1378_v24 = vmul.f32 %v1362_v58, %v1330_v51  ;;  %v1385_v56 = vadd.f32 %v1384_v36, %v1376_v7 }
 0x3bd   :  { %v1379_v60 = vmul.f32 %v1362_v58, %v1331_v27  ;;  %v1398_v61 = vadd.f32 %v1397_v25, %v1377_v54 }
 0x3be   :  { %v1386_v2 = vadd.f32 %v1385_v56, %v1378_v24 }
 0x3bf   :  { %v1399_v43 = vadd.f32 %v1398_v61, %v1379_v60 }
 0x3c0   :  { %v1387_v14 = vrot.slane %v1386_v2, 4 }
 0x3c1   :  { %v1400_v12 = vrot.slane %v1399_v43, 4 }
 0x3c2   :  { %v1388_v13 = vadd.f32 %v1387_v14, %v1386_v2 }
 0x3c3   :  { %v1401_v3 = vadd.f32 %v1400_v12, %v1399_v43 }
 0x3c4   :  { %v1389_v15 = vrot.slane %v1388_v13, 2 }
 0x3c5   :  { %v1402_v21 = vrot.slane %v1401_v3, 2 }
 0x3c6   :  { %v1390_v62 = vadd.f32 %v1389_v15, %v1388_v13 }
 0x3c7   :  { %v1403_v45 = vadd.f32 %v1402_v21, %v1401_v3 }
 0x3c8   :  { %v1391_v10 = vrot.slane %v1390_v62, 1 }
 0x3c9   :  { %v1404_v22 = vrot.slane %v1403_v45, 1 }
 0x3ca   :  { %v1392_v23 = vadd.f32 %v1391_v10, %v1390_v62 }
 0x3cb   :  { %v1405_v52 = vadd.f32 %v1404_v22, %v1403_v45 }
 0x3cc   :  { %v1411_v57 = vadd.f32 %v1409_v16, %v1392_v23 }
 0x3cd   :  { %v1412_v6 = vadd.f32 %v1409_v16, %v1405_v52 }
 0x3ce   :  { %v1413_v8 = vsub.f32 0.0, %v1411_v57 }
 0x3cf   :  { %v1414_v17 = vsub.f32 0.0, %v1412_v6 }
 0x3d0   :  { %v1415_v9 = vmul.f32 1.442695, %v1413_v8 }
 0x3d1   :  { %v1417_v1 = vmul.f32 1.442695, %v1414_v17 }
 0x3d2   :  { %1578 = vpow2.f32 %v1415_v9 }
 0x3d3   :  { %1580 = vpow2.f32 %v1417_v1 }
 0x3dc   :  { %v1579_v31 = vpop.eup %1578 }
 0x3dd   :  { %v1581_v53 = vpop.eup %1580  ;;  %v1419_v44 = vadd.f32 1.0, %v1579_v31 }
 0x3de   :  { %v1420_v11 = vadd.f32 1.0, %v1581_v53 }
 0x3df   :  { %1582 = vrcp.f32 %v1419_v44 }
 0x3e0   :  { %1584 = vrcp.f32 %v1420_v11 }
 0x3e9   :  { %v1583_v63 = vpop.eup %1582 }
 0x3ea   :  { %v1585_v49 = vpop.eup %1584 }
 0x3eb   :  { %v1427_v37 = vcombine.low %v1583_v63, %v1585_v49 }
 0x3ed   :  { %v1434_v35 = vrot.slane %v1427_v37, %v1433_v32 }
 0x3ef   :  { %v1441_v33 = vrot.slane %v1434_v35, %v1433_v32 }
 0x3f1   :  { %1447 = vst.msk [vmem:[#allocation2] sm:$0x3] %vm1445_vm0, %v1441_v33 }
 0x3f2   :  { %1613 = shalt.err (!%p1610_p4)
}
 0x3f3   :  { %s1614_s24 = scalar_lea.hbm %s2358_s4, 32 }
 0x3f4   :  { %p1615_p5 = scmp.ne.s32.totalorder %s2358_s4, %s1614_s24  ;;  %p1618_p6 = scmp.lt.u32.totalorder %s1614_s24, %s2358_s4 }
 0x3f6   :  { %p1620_p7 = pnand %p1618_p6, %p1615_p5 }
 0x3f8   :  { %1623 = shalt.err (!%p1620_p7)
}
 0x3f9   :  { %1457 = dma.vmem_to_hbm [thread:$0]  %s1455_s20, 32, %s2358_s4, [#allocation3]  }
 0x3fa   :  { %1624 = dma.done.wait [#allocation3], 32  }
 0x3fb   :  { %1625 = vsyncadd [#allocation3], 4294967264 }
 0x3fc   :  { %1461 = vsyncpa [#allocation3], 1 }

</bundles_post_ra>
